<compile_context>
chip_gen: v6e
topology: v6e:2x2x1
jax: 0.10.0
libtpu: 0.0.40
codegen_flags: <defaults>
</compile_context>

<pallas_src>
import numpy as np
import jax
import jax.numpy as jnp
from jax.experimental import pallas as pl
from jax.experimental.pallas import tpu as pltpu

IMAGE_TOKEN_INDEX = -200

VIS_TOKENS = 728   # fixed by nn.Linear(728, 14)
VIS_PAD = 768      # 728 zero-padded to a multiple of 128 (lane dense K)
IMG_TOKENS = 14
HIDDEN = 256       # synthetic LM hidden size (multiple of 128 -> lane dense)
VOCAB = 512        # synthetic vocab            (multiple of 128 -> lane dense)
T_PAD_MULT = 16    # spliced seq length padded to this multiple (bf16 sublane)


def _round_up(x, m):
    return (x + m - 1) // m * m


def _pick_tile(dim, cap, granule):
    """Largest tile <= cap that divides dim and is a multiple of granule
    (or the full dim when dim <= cap)."""
    t = min(cap, dim)
    if t == dim:
        return t
    t = (t // granule) * granule
    while t > granule and dim % t:
        t -= granule
    return max(t, granule)


# ----------------------------- Pallas kernels ------------------------------

def _proj_kernel(w_ref, b_ref, x_ref, o_ref):
    # For each batch element in this block: o = W (14, 768) @ x (768, H) + b.
    # x arrives f32 straight from HBM; cast to bf16 in-register (no extra
    # HBM pass), f32 MXU accumulation, bf16 output (activations stay bf16).
    w = w_ref[...]                       # (14, Kp) bf16
    bias = b_ref[...]                    # (14, 1)  f32
    for i in range(x_ref.shape[0]):      # static bblk unroll (2-D dots only)
        x = x_ref[i].astype(jnp.bfloat16)                       # (Kp, H)
        acc = jnp.dot(w, x, preferred_element_type=jnp.float32)  # (14, H) f32
        o_ref[i] = (acc + bias).astype(o_ref.dtype)


def project_image_features(x_pre, w_lin, b_lin):
    """arch == 'linear' branch of MM_Model.forward.

    x_pre: (B, 768, H) f32 (vision axis host-padded 728->768 with zeros,
    matching zero-padded w_lin columns) -> (B, 14, H) bf16.
    out[b] = W @ x_pre[b] + b is exactly the reference
    permute/view/linear/view/permute, with zero transposes and an H-wide
    (lane-dense) output written directly in the spliced layout.
    """
    B, Kp, H = x_pre.shape
    assert Kp == VIS_PAD

    # Batch elements per grid step: amortize per-step overhead for larger B,
    # but keep >= 2 parallel steps so both v7x TensorCores get work, and cap
    # the x block at ~8 MiB so double-buffered DMA fits VMEM comfortably.
    if B >= 4 and B % 2 == 0:
        bblk = min(B // 2, max(1, (8 << 20) // (Kp * H * 4)))
        while B % bblk:
            bblk -= 1
    else:
        bblk = 1

    return pl.pallas_call(
        _proj_kernel,
        out_shape=jax.ShapeDtypeStruct((B, IMG_TOKENS, H), jnp.bfloat16),
        grid=(B // bblk,),
        in_specs=[
            pl.BlockSpec((IMG_TOKENS, Kp), lambda g: (0, 0)),
            pl.BlockSpec((IMG_TOKENS, 1), lambda g: (0, 0)),
            pl.BlockSpec((bblk, Kp, H), lambda g: (g, 0, 0)),
        ],
        out_specs=pl.BlockSpec((bblk, IMG_TOKENS, H), lambda g: (g, 0, 0)),
        compiler_params=pltpu.CompilerParams(
            dimension_semantics=("parallel",)),
    )(w_lin, b_lin, x_pre)


def _mm_bias_kernel(x_ref, w_ref, b_ref, o_ref):
    # Tiled o = x @ w + b accumulating directly into the k-invariant f32
    # output block (no VMEM scratch, no final acc->o copy).
    @pl.when(pl.program_id(2) == 0)
    def _init():
        o_ref[...] = jnp.broadcast_to(b_ref[...], o_ref.shape)

    o_ref[...] += jnp.dot(x_ref[...], w_ref[...],
                          preferred_element_type=jnp.float32)


def pallas_linear(x, w, b, *, tm=256, tn=256, tk=512):
    """x: (M, K) bf16, w: (K, N) bf16 (pre-cast once), b: (1, N) f32 -> (M, N) f32.

    M must be a multiple of 8 (guaranteed by splice-time T padding), N and K
    multiples of 128 (HIDDEN/VOCAB).  At toy shapes the whole problem is one
    M/K block with N split in two -> grid (1, 2, 1): minimal per-step
    overhead, both v7x TCs active.  For a real Phi head raise tn toward
    512-1024 on v6e and re-derive the budget against v7x's 64 MiB VMEM
    (32 MiB scoped default) / v5e's 16 MiB scoped default.
    """
    M, K = x.shape
    Kw, N = w.shape
    assert K == Kw and b.shape == (1, N)

    tm = _pick_tile(M, tm, 8)
    tk = _pick_tile(K, tk, 128)
    tn = _pick_tile(N, tn, 128)
    assert M % tm == 0 and K % tk == 0 and N % tn == 0, (M, K, N, tm, tk, tn)

    return pl.pallas_call(
        _mm_bias_kernel,
        out_shape=jax.ShapeDtypeStruct((M, N), jnp.float32),
        grid_spec=pltpu.PrefetchScalarGridSpec(
            num_scalar_prefetch=0,
            grid=(M // tm, N // tn, K // tk),
            in_specs=[
                pl.BlockSpec((tm, tk), lambda i, j, k: (i, k)),
                pl.BlockSpec((tk, tn), lambda i, j, k: (k, j)),
                pl.BlockSpec((1, tn), lambda i, j, k: (0, j)),
            ],
            out_specs=pl.BlockSpec((tm, tn), lambda i, j, k: (i, j))),
        compiler_params=pltpu.CompilerParams(
            dimension_semantics=("parallel", "parallel", "arbitrary")),
    )(x, w, b)


# ------------------------------ Model pieces -------------------------------

def init_params(key):
    k_noise, k_emb, k_lm_w, k_lm_b = jax.random.split(key, 4)

    # self.linear = nn.Linear(728, 14): block-average init + 0.01 * randn,
    # exactly as MM_Model.__init__ (args.resume == 'None', arch == 'linear').
    avg = VIS_TOKENS // IMG_TOKENS  # 52
    noise = np.asarray(jax.random.normal(
        k_noise, (IMG_TOKENS, avg), dtype=jnp.float32)) * 0.01
    w_lin = np.zeros((IMG_TOKENS, VIS_PAD), dtype=np.float32)  # cols 728:768 stay 0
    for i in range(IMG_TOKENS):
        w_lin[i, i * avg:(i + 1) * avg] = 1.0 / avg + noise[i]
    b_lin = np.zeros((IMG_TOKENS, 1), dtype=np.float32)

    # Synthetic language model: embedding table + linear LM head.
    embed_table = jax.random.normal(
        k_emb, (VOCAB, HIDDEN), dtype=jnp.float32) * 0.02
    w_lm = jax.random.normal(k_lm_w, (HIDDEN, VOCAB), dtype=jnp.float32) * 0.05
    b_lm = jax.random.normal(k_lm_b, (VOCAB,), dtype=jnp.float32) * 0.01

    return dict(
        # Weights pre-cast / pre-padded / pre-shaped ONCE here -> no per-call
        # cast/pad/reshape passes inside the jitted forward.
        w_lin=jnp.asarray(w_lin).astype(jnp.bfloat16),          # (14, 768) bf16
        b_lin=jnp.asarray(b_lin),                               # (14, 1)   f32
        embed_table=embed_table.astype(jnp.bfloat16),           # (V, H)    bf16
        w_lm=w_lm.astype(jnp.bfloat16),                         # (H, V)    bf16
        b_lm=b_lm.reshape(1, VOCAB),                            # (1, V)    f32
    )


def build_splice_tables(input_ids_np, attention_mask_np):
    """Host-side (numpy-only) index arithmetic mirroring
    prepare_inputs_labels_for_multimodal: each IMAGE_TOKEN_INDEX is replaced
    by IMG_TOKENS projected feature rows, sequences are right-padded.  The
    padded length is rounded up to T_PAD_MULT so the LM-head M dim needs no
    further padding (padded rows are zero-embedded and masked out)."""
    B, _ = input_ids_np.shape
    seqs = []
    for b in range(B):
        ids = input_ids_np[b][attention_mask_np[b].astype(bool)]
        pos = int(np.where(ids == IMAGE_TOKEN_INDEX)[0][0])
        pre, post = ids[:pos], ids[pos + 1:]
        tok = np.concatenate([pre, np.zeros(IMG_TOKENS, ids.dtype), post])
        img = np.concatenate([np.zeros(pos, np.int64),
                              b * IMG_TOKENS + np.arange(IMG_TOKENS),
                              np.zeros(post.size, np.int64)])
        is_img = np.concatenate([np.zeros(pos, bool),
                                 np.ones(IMG_TOKENS, bool),
                                 np.zeros(post.size, bool)])
        seqs.append((tok, img, is_img))

    max_len = _round_up(max(s[0].size for s in seqs), T_PAD_MULT)
    token_idx = np.zeros((B, max_len), np.int32)
    img_idx = np.zeros((B, max_len), np.int32)
    is_text = np.zeros((B, max_len), bool)
    is_image = np.zeros((B, max_len), bool)
    attn = np.zeros((B, max_len), np.int32)
    for b, (tok, img, im) in enumerate(seqs):
        n = tok.size
        token_idx[b, :n] = tok
        img_idx[b, :n] = img
        is_image[b, :n] = im
        is_text[b, :n] = ~im
        attn[b, :n] = 1
    return token_idx, img_idx, is_text, is_image, attn


@jax.jit
def _forward_device(x_pre_padded, token_idx, img_idx, is_text, is_image, params):
    # 1) arch == 'linear' projection (Pallas, per-batch W @ x, no transposes,
    #    f32 input read once, bf16 output).
    image_features = project_image_features(
        x_pre_padded, params["w_lin"], params["b_lin"])          # (B,14,H) bf16

    # 2) dropout — eval-mode identity.
    # TODO(synk): stochastic nn.Dropout(p=args.dropout) not reproduced.

    # 3) multimodal splicing: one embed-table gather + one image-feature
    #    gather + select, all in bf16 (replaces per-sequence concat/stack).
    text_emb = jnp.take(params["embed_table"], token_idx, axis=0)   # (B,T,H) bf16
    img_flat = image_features.reshape(-1, image_features.shape[-1])  # (B*14,H)
    img_emb = jnp.take(img_flat, img_idx, axis=0)                    # (B,T,H) bf16
    zero = jnp.zeros((), jnp.bfloat16)
    inputs_embeds = (jnp.where(is_text[..., None], text_emb, zero)
                     + jnp.where(is_image[..., None], img_emb, zero))  # bf16

    # 4) language model -> logits (Pallas tiled matmul+bias stand-in).
    # TODO(synk): pretrained Phi LM + LoRA adapters have no self-contained
    # Pallas equivalent; replaced by a deterministic linear head.
    B, T, H = inputs_embeds.shape
    logits = pallas_linear(inputs_embeds.reshape(B * T, H),
                           params["w_lm"], params["b_lm"])
    return logits.reshape(B, T, VOCAB)


def mm_model_forward(input_ids_np, image_features_pre_proj,
                     attention_mask_np, params):
    token_idx, img_idx, is_text, is_image, attn = build_splice_tables(
        np.asarray(input_ids_np), np.asarray(attention_mask_np))

    # Host-side zero-pad of the vision-token axis 728 -> 768 (multiple of 128)
    # so every projection tile is lane dense; mathematically free because
    # w_lin is zero over the padded columns.
    x_np = np.asarray(image_features_pre_proj, dtype=np.float32)
    pad = VIS_PAD - x_np.shape[1]
    if pad:
        x_np = np.pad(x_np, ((0, 0), (0, pad), (0, 0)))

    logits = _forward_device(jnp.asarray(x_np),
                             jnp.asarray(token_idx), jnp.asarray(img_idx),
                             jnp.asarray(is_text), jnp.asarray(is_image),
                             params)
    return logits, jnp.asarray(attn)


# ---------------------------------- main -----------------------------------

if __name__ == "__main__":
    root = jax.random.PRNGKey(0)
    k_params, k_ids, k_feat = jax.random.split(root, 3)
    params = init_params(k_params)

    B, L = 2, 8
    input_ids = np.asarray(
        jax.random.randint(k_ids, (B, L), 0, VOCAB)).astype(np.int64)
    input_ids[:, 3] = IMAGE_TOKEN_INDEX            # one <image> token per seq
    attention_mask = np.ones((B, L), dtype=np.int32)

    image_features_pre_proj = np.asarray(jax.random.normal(
        k_feat, (B, VIS_TOKENS, HIDDEN), dtype=jnp.float32))

    logits, out_mask = mm_model_forward(
        input_ids, image_features_pre_proj, attention_mask, params)
    logits = jax.block_until_ready(logits)
    out_mask = jax.block_until_ready(out_mask)

    spliced_T = L - 1 + IMG_TOKENS                 # 21 real positions
    padded_T = _round_up(spliced_T, T_PAD_MULT)    # 32 (padded, masked) rows
    assert logits.shape == (B, padded_T, VOCAB), logits.shape
    assert out_mask.shape == (B, padded_T), out_mask.shape
    assert bool(jnp.all(out_mask.sum(axis=1) == spliced_T))
    assert bool(jnp.all(jnp.isfinite(logits)))
    print("KERNEL_OK")
</pallas_src>

<mosaic_0001>
module attributes {stable_mosaic.version = 11 : i64} {
  func.func @_proj_kernel(%arg0: i32, %arg1: memref<14x768xbf16, #tpu.memory_space<vmem>>, %arg2: memref<14x1xf32, #tpu.memory_space<vmem>>, %arg3: memref<1x768x256xf32, #tpu.memory_space<vmem>>, %arg4: memref<1x14x256xbf16, #tpu.memory_space<vmem>>) attributes {dimension_semantics = [#tpu.dimension_semantics<parallel>], iteration_bounds = array<i64: 2>, scalar_prefetch = 0 : i64, scratch_operands = 0 : i64, tpu.core_type = #tpu.core_type<tc>, window_params = [{pipeline_mode = #tpu.pipeline_mode<synchronous>, transform_indices = @transform_0, window_bounds = array<i64: 14, 768>}, {pipeline_mode = #tpu.pipeline_mode<synchronous>, transform_indices = @transform_1, window_bounds = array<i64: 14, 1>}, {transform_indices = @transform_2, window_bounds = array<i64: 1, 768, 256>}, {transform_indices = @transform_3, window_bounds = array<i64: 1, 14, 256>}]} {
    %c0 = arith.constant 0 : index
    %c0_0 = arith.constant 0 : index
    %0 = vector.load %arg1[%c0, %c0_0] : memref<14x768xbf16, #tpu.memory_space<vmem>>, vector<14x768xbf16>
    %c0_1 = arith.constant 0 : index
    %c0_2 = arith.constant 0 : index
    %1 = vector.load %arg2[%c0_1, %c0_2] : memref<14x1xf32, #tpu.memory_space<vmem>>, vector<14x1xf32>
    %c0_3 = arith.constant 0 : index
    %c0_4 = arith.constant 0 : index
    %c0_5 = arith.constant 0 : index
    %2 = vector.load %arg3[%c0_3, %c0_4, %c0_5] : memref<1x768x256xf32, #tpu.memory_space<vmem>>, vector<1x768x256xf32>
    %3 = vector.shape_cast %2 : vector<1x768x256xf32> to vector<768x256xf32>
    %4 = arith.truncf %3 : vector<768x256xf32> to vector<768x256xbf16>
    %cst = arith.constant dense<0.000000e+00> : vector<14x256xf32>
    %5 = tpu.matmul %0, %4, %cst {dimension_numbers = #tpu.dot_dimension_numbers<[1], [0], [0], [1], [0, 0, 1, 1], [], []>} : vector<14x768xbf16>, vector<768x256xbf16>, vector<14x256xf32> -> vector<14x256xf32>
    %6 = vector.broadcast %1 : vector<14x1xf32> to vector<14x256xf32>
    %7 = arith.addf %5, %6 : vector<14x256xf32>
    %8 = arith.truncf %7 : vector<14x256xf32> to vector<14x256xbf16>
    %c0_6 = arith.constant 0 : index
    %c0_7 = arith.constant 0 : index
    %c0_8 = arith.constant 0 : index
    %9 = vector.load %arg4[%c0_6, %c0_7, %c0_8] : memref<1x14x256xbf16, #tpu.memory_space<vmem>>, vector<1x14x256xbf16>
    %10 = vector.shape_cast %9 : vector<1x14x256xbf16> to vector<14x256xbf16>
    %11 = vector.shape_cast %8 : vector<14x256xbf16> to vector<1x14x256xbf16>
    tpu.vector_store %arg4[%c0_6, %c0_7, %c0_8], %11 {strides = array<i32>} : memref<1x14x256xbf16, #tpu.memory_space<vmem>>, vector<1x14x256xbf16>,
    return
  }
  func.func @transform_0(%arg0: i32) -> (i32, i32) {
    %c0_i32 = arith.constant 0 : i32
    %c0_i32_0 = arith.constant 0 : i32
    %c0_i32_1 = arith.constant 0 : i32
    return %c0_i32, %c0_i32_0 : i32, i32
  }
  func.func @transform_1(%arg0: i32) -> (i32, i32) {
    %c0_i32 = arith.constant 0 : i32
    %c0_i32_0 = arith.constant 0 : i32
    %c0_i32_1 = arith.constant 0 : i32
    return %c0_i32, %c0_i32_0 : i32, i32
  }
  func.func @transform_2(%arg0: i32) -> (i32, i32, i32) {
    %c0_i32 = arith.constant 0 : i32
    %c0_i32_0 = arith.constant 0 : i32
    %c0_i32_1 = arith.constant 0 : i32
    return %arg0, %c0_i32, %c0_i32_0 : i32, i32, i32
  }
  func.func @transform_3(%arg0: i32) -> (i32, i32, i32) {
    %c0_i32 = arith.constant 0 : i32
    %c0_i32_0 = arith.constant 0 : i32
    %c0_i32_1 = arith.constant 0 : i32
    return %arg0, %c0_i32, %c0_i32_0 : i32, i32, i32
  }
}

module attributes {stable_mosaic.version = 11 : i64} {
  func.func @_mm_bias_kernel(%arg0: i32, %arg1: i32, %arg2: i32, %arg3: memref<64x256xbf16, #tpu.memory_space<vmem>>, %arg4: memref<256x256xbf16, #tpu.memory_space<vmem>>, %arg5: memref<1x256xf32, #tpu.memory_space<vmem>>, %arg6: memref<64x256xf32, #tpu.memory_space<vmem>>) attributes {dimension_semantics = [#tpu.dimension_semantics<parallel>, #tpu.dimension_semantics<parallel>, #tpu.dimension_semantics<arbitrary>], iteration_bounds = array<i64: 1, 2, 1>, scalar_prefetch = 0 : i64, scratch_operands = 0 : i64, tpu.core_type = #tpu.core_type<tc>, window_params = [{transform_indices = @transform_0, window_bounds = array<i64: 64, 256>}, {transform_indices = @transform_1, window_bounds = array<i64: 256, 256>}, {transform_indices = @transform_2, window_bounds = array<i64: 1, 256>}, {transform_indices = @transform_3, window_bounds = array<i64: 64, 256>}]} {
    %c0_i32 = arith.constant 0 : i32
    %0 = arith.cmpi eq, %arg2, %c0_i32 : i32
    %1 = arith.extui %0 : i1 to i32
    %c0_i32_0 = arith.constant 0 : i32
    %2 = arith.cmpi ne, %1, %c0_i32_0 : i32
    scf.if %2 {
      %c0_8 = arith.constant 0 : index
      %c0_9 = arith.constant 0 : index
      %9 = vector.load %arg5[%c0_8, %c0_9] : memref<1x256xf32, #tpu.memory_space<vmem>>, vector<1x256xf32>
      %10 = vector.shape_cast %9 : vector<1x256xf32> to vector<1x256xf32>
      %11 = vector.broadcast %10 : vector<1x256xf32> to vector<64x256xf32>
      %c0_10 = arith.constant 0 : index
      %c0_11 = arith.constant 0 : index
      %12 = vector.load %arg6[%c0_10, %c0_11] : memref<64x256xf32, #tpu.memory_space<vmem>>, vector<64x256xf32>
      tpu.vector_store %arg6[%c0_10, %c0_11], %11 {strides = array<i32>} : memref<64x256xf32, #tpu.memory_space<vmem>>, vector<64x256xf32>,
    } else {
    }
    %c0 = arith.constant 0 : index
    %c0_1 = arith.constant 0 : index
    %3 = vector.load %arg6[%c0, %c0_1] : memref<64x256xf32, #tpu.memory_space<vmem>>, vector<64x256xf32>
    %c0_2 = arith.constant 0 : index
    %c0_3 = arith.constant 0 : index
    %4 = vector.load %arg3[%c0_2, %c0_3] : memref<64x256xbf16, #tpu.memory_space<vmem>>, vector<64x256xbf16>
    %c0_4 = arith.constant 0 : index
    %c0_5 = arith.constant 0 : index
    %5 = vector.load %arg4[%c0_4, %c0_5] : memref<256x256xbf16, #tpu.memory_space<vmem>>, vector<256x256xbf16>
    %cst = arith.constant dense<0.000000e+00> : vector<64x256xf32>
    %6 = tpu.matmul %4, %5, %cst {dimension_numbers = #tpu.dot_dimension_numbers<[1], [0], [0], [1], [0, 0, 1, 1], [], []>} : vector<64x256xbf16>, vector<256x256xbf16>, vector<64x256xf32> -> vector<64x256xf32>
    %7 = arith.addf %3, %6 : vector<64x256xf32>
    %c0_6 = arith.constant 0 : index
    %c0_7 = arith.constant 0 : index
    %8 = vector.load %arg6[%c0_6, %c0_7] : memref<64x256xf32, #tpu.memory_space<vmem>>, vector<64x256xf32>
    tpu.vector_store %arg6[%c0_6, %c0_7], %7 {strides = array<i32>} : memref<64x256xf32, #tpu.memory_space<vmem>>, vector<64x256xf32>,
    return
  }
  func.func @transform_0(%arg0: i32, %arg1: i32, %arg2: i32) -> (i32, i32) {
    %c0_i32 = arith.constant 0 : i32
    return %arg0, %arg2 : i32, i32
  }
  func.func @transform_1(%arg0: i32, %arg1: i32, %arg2: i32) -> (i32, i32) {
    %c0_i32 = arith.constant 0 : i32
    return %arg2, %arg1 : i32, i32
  }
  func.func @transform_2(%arg0: i32, %arg1: i32, %arg2: i32) -> (i32, i32) {
    %c0_i32 = arith.constant 0 : i32
    %c0_i32_0 = arith.constant 0 : i32
    return %c0_i32, %arg1 : i32, i32
  }
  func.func @transform_3(%arg0: i32, %arg1: i32, %arg2: i32) -> (i32, i32) {
    %c0_i32 = arith.constant 0 : i32
    return %arg0, %arg1 : i32, i32
  }
}

</mosaic_0001>

<bundles_post_ra>
// kernel: _forward_device.3
= control target key start
LH: loop header
LB: loop body
LE: loop exit
PB: predicated region body
PF: predicated region fallthrough
CT: control target
= control target key end

     0   :  { %8 = vsyncpa [#allocation4], 0  ;;  %s1527_s0 = inlined_call_operand.vmem [shape: bf16[64,256], index: 0, kind: input, shape index: {}]   ;;  %s1528_s1 = inlined_call_operand.vmem [shape: bf16[256,512], index: 1, kind: input, shape index: {}]   ;;  %s1529_s2 = inlined_call_operand.vmem [shape: f32[1,512], index: 2, kind: input, shape index: {}]   ;;  %s1530_s3 = inlined_call_operand.hbm [shape: f32[64,512], index: 3, kind: output, shape index: {}]  }
   0x1   :  { %10 = vsyncpa [#allocation4 + $0x1], 0  ;;  %s1255_s12 = smov 0   ;;  %s1257_s13 = smov 0  }
   0x2   :  { %s1259_s14 = smov 0   ;;  %s1261_s15 = smov 0  }
   0x3   :  { %s1263_s16 = smov 0   ;;  %s1265_s17 = smov 0  }
   0x4 LB: > { %s944_s18 = sadd.s32 4294967295, %s1229_s17   ;;  %s945_s19 = sadd.s32 4294967294, %s1229_s17   ;;  %s1229_s17 = sphi %s1265_s17, %s16_s17   ;;  %s1225_s16 = sphi %s1263_s16, %s1537_s16   ;;  %s1221_s15 = sphi %s1261_s15, %s1536_s15   ;;  %s1217_s14 = sphi %s1259_s14, %s1535_s14   ;;  %s1213_s13 = sphi %s1257_s13, %s1534_s13   ;;  %s1209_s12 = sphi %s1255_s12, %s1533_s12  }
   0x5   : > { %s31_s20 = sadd.s32 1, %s1225_s16  ;;  %s72_s21 = sadd.s32 1, %s1217_s14 }
   0x6   : > { %p33_p0 = scmp.ge.s32.totalorder %s31_s20, 2  ;;  %p79_p1 = scmp.ne.s32.totalorder %s1217_s14, %s1213_s13 }
   0x7   : > { %p80_p2 = scmp.eq.s32.totalorder %s1229_s17, 0  ;;  %p137_p3 = scmp.eq.s32.totalorder %s944_s18, 1 }
   0x8   : > { %s1539_s20 = smov (%p33_p0, %s31_s20), 0  ;;  %p142_p6 = scmp.ne.s32.totalorder %s1213_s13, %s1209_s12 }
   0x9   : > { %p81_p4 = por %p80_p2, %p79_p1  ;;  %p1294_p5 = por %p137_p3, %p79_p1 }
   0xa   : > { %s68_s23 = ssub.s32 %s1225_s16, %s1539_s20  ;;  %p143_p8 = scmp.eq.s32.totalorder %s945_s19, 1 }
   0xb   : > { %p70_p7 = scmp.eq.s32.totalorder %s68_s23, 0  ;;  %p948_p10 = scmp.ge.s32.totalorder %s1229_s17, 2 }
   0xc   : > { %p1305_p9 = por %p143_p8, %p142_p6 }
   0xd   : > { %s1303_s24 = scalar_select %p70_p7, %s1217_s14, %s72_s21  }
   0xe   : > { %174 = sbr.rel (%p948_p10) target bundleno = 39 (0x27), region = 20 }
  0x13   : > { %177 = sbr.rel (!%p81_p4) target bundleno = 39 (0x27), region = 24  ;;  %s179_s26 = sand.u32 (%p81_p4), 1, %s1217_s14  }
  0x14   : > { %s1001_s27 = sshll.u32 (%p81_p4), %s1225_s16, 3  ;;  %s949_s28 = sshll.u32 (%p81_p4), %s179_s26, 8 }
  0x15   : > { %s1317_s4 = scalar_lea.vmem (%p81_p4), %s1528_s1, %s1001_s27  ;;  %s1322_s5 = scalar_lea.vmem (%p81_p4), [#allocation2], %s949_s28 }
  0x16   : > { %v278_v0 = vld [vmem:[%s1317_s4] sm:$0xff] (%p81_p4)  ;;  %v280_v1 = vld [vmem:[%s1317_s4 + $0x10] sm:$0xff] (%p81_p4) }
  0x17   : > { %v282_v2 = vld [vmem:[%s1317_s4 + $0x20] sm:$0xff] (%p81_p4)  ;;  %279 = vst [vmem:[%s1322_s5] sm:$0xff] (%p81_p4), %v278_v0  ;;  %281 = vst [vmem:[%s1322_s5 + $0x8] sm:$0xff] (%p81_p4), %v280_v1  ;;  %v284_v3 = vld [vmem:[%s1317_s4 + $0x30] sm:$0xff] (%p81_p4) }
  0x18   : > { %283 = vst [vmem:[%s1322_s5 + $0x10] sm:$0xff] %v282_v2  ;;  %v286_v4 = vld [vmem:[%s1317_s4 + $0x40] sm:$0xff]  ;;  %v288_v5 = vld [vmem:[%s1317_s4 + $0x50] sm:$0xff]  ;;  %285 = vst [vmem:[%s1322_s5 + $0x18] sm:$0xff] %v284_v3 }
  0x19   : > { %287 = vst [vmem:[%s1322_s5 + $0x20] sm:$0xff] %v286_v4  ;;  %289 = vst [vmem:[%s1322_s5 + $0x28] sm:$0xff] %v288_v5  ;;  %v290_v6 = vld [vmem:[%s1317_s4 + $0x60] sm:$0xff]  ;;  %v292_v7 = vld [vmem:[%s1317_s4 + $0x70] sm:$0xff] }
  0x1a   : > { %v294_v8 = vld [vmem:[%s1317_s4 + $0x80] sm:$0xff]  ;;  %291 = vst [vmem:[%s1322_s5 + $0x30] sm:$0xff] %v290_v6  ;;  %293 = vst [vmem:[%s1322_s5 + $0x38] sm:$0xff] %v292_v7  ;;  %v296_v9 = vld [vmem:[%s1317_s4 + $0x90] sm:$0xff] }
  0x1b   : > { %295 = vst [vmem:[%s1322_s5 + $0x40] sm:$0xff] %v294_v8  ;;  %v298_v10 = vld [vmem:[%s1317_s4 + $0xa0] sm:$0xff]  ;;  %v300_v11 = vld [vmem:[%s1317_s4 + $0xb0] sm:$0xff]  ;;  %297 = vst [vmem:[%s1322_s5 + $0x48] sm:$0xff] %v296_v9 }
  0x1c   : > { %299 = vst [vmem:[%s1322_s5 + $0x50] sm:$0xff] %v298_v10  ;;  %301 = vst [vmem:[%s1322_s5 + $0x58] sm:$0xff] %v300_v11  ;;  %v302_v12 = vld [vmem:[%s1317_s4 + $0xc0] sm:$0xff]  ;;  %v304_v13 = vld [vmem:[%s1317_s4 + $0xd0] sm:$0xff] }
  0x1d   : > { %v306_v14 = vld [vmem:[%s1317_s4 + $0xe0] sm:$0xff]  ;;  %303 = vst [vmem:[%s1322_s5 + $0x60] sm:$0xff] %v302_v12  ;;  %305 = vst [vmem:[%s1322_s5 + $0x68] sm:$0xff] %v304_v13  ;;  %v308_v15 = vld [vmem:[%s1317_s4 + $0xf0] sm:$0xff] }
  0x1e   : > { %307 = vst [vmem:[%s1322_s5 + $0x70] sm:$0xff] %v306_v14  ;;  %v310_v16 = vld [vmem:[%s1317_s4 + $0x100] sm:$0xff]  ;;  %v312_v17 = vld [vmem:[%s1317_s4 + $0x110] sm:$0xff]  ;;  %309 = vst [vmem:[%s1322_s5 + $0x78] sm:$0xff] %v308_v15 }
  0x1f   : > { %311 = vst [vmem:[%s1322_s5 + $0x80] sm:$0xff] %v310_v16  ;;  %313 = vst [vmem:[%s1322_s5 + $0x88] sm:$0xff] %v312_v17  ;;  %v314_v18 = vld [vmem:[%s1317_s4 + $0x120] sm:$0xff]  ;;  %v316_v19 = vld [vmem:[%s1317_s4 + $0x130] sm:$0xff] }
  0x20   : > { %v318_v20 = vld [vmem:[%s1317_s4 + $0x140] sm:$0xff]  ;;  %315 = vst [vmem:[%s1322_s5 + $0x90] sm:$0xff] %v314_v18  ;;  %317 = vst [vmem:[%s1322_s5 + $0x98] sm:$0xff] %v316_v19  ;;  %v320_v21 = vld [vmem:[%s1317_s4 + $0x150] sm:$0xff] }
  0x21   : > { %319 = vst [vmem:[%s1322_s5 + $0xa0] sm:$0xff] %v318_v20  ;;  %v322_v22 = vld [vmem:[%s1317_s4 + $0x160] sm:$0xff]  ;;  %v324_v23 = vld [vmem:[%s1317_s4 + $0x170] sm:$0xff]  ;;  %321 = vst [vmem:[%s1322_s5 + $0xa8] sm:$0xff] %v320_v21 }
  0x22   : > { %323 = vst [vmem:[%s1322_s5 + $0xb0] sm:$0xff] %v322_v22  ;;  %325 = vst [vmem:[%s1322_s5 + $0xb8] sm:$0xff] %v324_v23  ;;  %v326_v24 = vld [vmem:[%s1317_s4 + $0x180] sm:$0xff]  ;;  %v328_v25 = vld [vmem:[%s1317_s4 + $0x190] sm:$0xff] }
  0x23   : > { %v330_v26 = vld [vmem:[%s1317_s4 + $0x1a0] sm:$0xff]  ;;  %327 = vst [vmem:[%s1322_s5 + $0xc0] sm:$0xff] %v326_v24  ;;  %329 = vst [vmem:[%s1322_s5 + $0xc8] sm:$0xff] %v328_v25  ;;  %v332_v27 = vld [vmem:[%s1317_s4 + $0x1b0] sm:$0xff] }
  0x24   : > { %331 = vst [vmem:[%s1322_s5 + $0xd0] sm:$0xff] %v330_v26  ;;  %v334_v28 = vld [vmem:[%s1317_s4 + $0x1c0] sm:$0xff]  ;;  %v336_v29 = vld [vmem:[%s1317_s4 + $0x1d0] sm:$0xff]  ;;  %333 = vst [vmem:[%s1322_s5 + $0xd8] sm:$0xff] %v332_v27 }
  0x25   : > { %335 = vst [vmem:[%s1322_s5 + $0xe0] sm:$0xff] %v334_v28  ;;  %337 = vst [vmem:[%s1322_s5 + $0xe8] sm:$0xff] %v336_v29  ;;  %v338_v30 = vld [vmem:[%s1317_s4 + $0x1e0] sm:$0xff]  ;;  %v340_v31 = vld [vmem:[%s1317_s4 + $0x1f0] sm:$0xff] }
  0x26   : > { %339 = vst [vmem:[%s1322_s5 + $0xf0] sm:$0xff] %v338_v30  ;;  %341 = vst [vmem:[%s1322_s5 + $0xf8] sm:$0xff] %v340_v31 }
  0x27 PF: > { %p952_p11 = scmp.ge.s32.totalorder %s1229_s17, 1  ;;  %p354_p12 = scmp.lt.s32.totalorder %s1229_s17, 3 }
  0x29   : > { %p355_p13 = pnand %p952_p11, %p354_p12 }
  0x2a   : > { %s1388_s6 = sand.u32 (!%p355_p13), 1, %s1213_s13   ;;  %s955_s9 = sshll.u32 (!%p355_p13), %s1221_s15, 1 }
  0x2b   : > { %358 = sbr.rel (%p355_p13) target bundleno = 338 (0x152), region = 66  ;;  %s953_s7 = sshll.u32 (!%p355_p13), %s1388_s6, 8 }
  0x2c   : > { %s1397_s18 = scalar_lea.vmem (!%p355_p13), [#allocation2], %s953_s7  ;;  %p413_p0 = scmp.lt.s32.totalorder (!%p355_p13), %s955_s9, 3 }
  0x2d   : > { %s954_s19 = sshll.u32 (!%p355_p13), %s1388_s6, 7  ;;  %s1002_s23 = sshll.u32 (!%p355_p13), %s1221_s15, 8 }
  0x2e   : > { %s1454_s21 = scalar_lea.vmem (!%p355_p13), [#allocation3], %s954_s19  ;;  %s1473_s15 = scalar_lea.hbm (!%p355_p13), %s1530_s3, %s1002_s23 }
  0x2f   : > { %s829_s26 = sshll.u32 (!%p355_p13), %s1454_s21, 4  ;;  %s813_s29 = scalar_lea.sflag (!%p355_p13), [#allocation4], %s1388_s6  ;;  %s1475_s26 = int_to_ptr.vmem [resolvable:$true] %s829_s26 }
  0x30   : > { %v1143_v32 = vld [vmem:[%s1527_s0 + $0x4] ss:$8 sps:$4 sm:$0xff]   ;;  %v1093_v34 = vld [vmem:[%s1397_s18 + $0x74] ss:$8 sps:$4 sm:$0xff]   ;;  %v1095_v35 = vld [vmem:[%s1397_s18 + $0x70] ss:$8 sps:$4 sm:$0xff]   ;;  %v425_v8 = vlaneseq }
  0x31   : > { %v1146_v33 = vld [vmem:[%s1527_s0 + $0x24] ss:$8 sps:$4 sm:$0xff]   ;;  %739 = vmatprep.mubr.bf16.mxu0 %v1143_v32  ;;  %707 = vmatprep.subr.bf16.mxu0 %v1093_v34  ;;  %v1098_v37 = vld [vmem:[%s1397_s18 + $0x60] ss:$8 sps:$4 sm:$0xff]   ;;  %v1099_v38 = vld [vmem:[%s1397_s18 + $0x54] ss:$8 sps:$4 sm:$0xff]  }
  0x32   : > { %759 = vmatprep.mubr.bf16.mxu1 %v1146_v33  ;;  %1003 = vmatprep.subr.bf16.mxu1 %v1093_v34  ;;  %v1096_v36 = vld [vmem:[%s1397_s18 + $0x64] ss:$8 sps:$4 sm:$0xff]   ;;  %v1101_v39 = vld [vmem:[%s1397_s18 + $0x50] ss:$8 sps:$4 sm:$0xff]   ;;  %v1104_v41 = vld [vmem:[%s1397_s18 + $0x40] ss:$8 sps:$4 sm:$0xff]  }
  0x33   : > { %708 = vmatpush1.bf16.msra.mxu0 %v1095_v35  ;;  %1019 = vmatpush1.bf16.msra.mxu1 %v1095_v35  ;;  %v1102_v40 = vld [vmem:[%s1397_s18 + $0x44] ss:$8 sps:$4 sm:$0xff]   ;;  %v1105_v42 = vld [vmem:[%s1397_s18 + $0x34] ss:$8 sps:$4 sm:$0xff]   ;;  %v1107_v43 = vld [vmem:[%s1397_s18 + $0x30] ss:$8 sps:$4 sm:$0xff]  }
  0x34   : > { %709 = vmatprep.subr.bf16.mxu0 %v1096_v36  ;;  %1004 = vmatprep.subr.bf16.mxu1 %v1096_v36  ;;  %v1108_v44 = vld [vmem:[%s1397_s18 + $0x24] ss:$8 sps:$4 sm:$0xff]   ;;  %v1110_v45 = vld [vmem:[%s1397_s18 + $0x20] ss:$8 sps:$4 sm:$0xff]   ;;  %v1111_v46 = vld [vmem:[%s1397_s18 + $0x14] ss:$8 sps:$4 sm:$0xff]  }
  0x35   : > { %v1113_v47 = vld [vmem:[%s1397_s18 + $0x10] ss:$8 sps:$4 sm:$0xff]   ;;  %v1114_v48 = vld [vmem:[%s1397_s18 + $0x4] ss:$8 sps:$4 sm:$0xff]   ;;  %v1116_v49 = vld [vmem:[%s1397_s18] ss:$8 sps:$4 sm:$0xff]  }
  0x36   : > { %v1117_v50 = vld [vmem:[%s1397_s18 + $0xf4] ss:$8 sps:$4 sm:$0xff]   ;;  %v1119_v51 = vld [vmem:[%s1397_s18 + $0xf0] ss:$8 sps:$4 sm:$0xff]   ;;  %v1120_v52 = vld [vmem:[%s1397_s18 + $0xe4] ss:$8 sps:$4 sm:$0xff]  }
  0x37   : > { %710 = vmatpush1.bf16.msra.mxu0 %v1098_v37  ;;  %1020 = vmatpush1.bf16.msra.mxu1 %v1098_v37  ;;  %v1122_v53 = vld [vmem:[%s1397_s18 + $0xe0] ss:$8 sps:$4 sm:$0xff]   ;;  %v1123_v54 = vld [vmem:[%s1397_s18 + $0xd4] ss:$8 sps:$4 sm:$0xff]   ;;  %v1125_v55 = vld [vmem:[%s1397_s18 + $0xd0] ss:$8 sps:$4 sm:$0xff]  }
  0x38   : > { %711 = vmatprep.subr.bf16.mxu0 %v1099_v38  ;;  %1005 = vmatprep.subr.bf16.mxu1 %v1099_v38  ;;  %v1126_v56 = vld [vmem:[%s1397_s18 + $0xc4] ss:$8 sps:$4 sm:$0xff]   ;;  %v1128_v57 = vld [vmem:[%s1397_s18 + $0xc0] ss:$8 sps:$4 sm:$0xff]   ;;  %v1129_v58 = vld [vmem:[%s1397_s18 + $0xb4] ss:$8 sps:$4 sm:$0xff]  }
  0x39   : > { %v1131_v59 = vld [vmem:[%s1397_s18 + $0xb0] ss:$8 sps:$4 sm:$0xff]   ;;  %v1132_v60 = vld [vmem:[%s1397_s18 + $0xa4] ss:$8 sps:$4 sm:$0xff]   ;;  %v1134_v61 = vld [vmem:[%s1397_s18 + $0xa0] ss:$8 sps:$4 sm:$0xff]  }
  0x3a   : > { %v1135_v62 = vld [vmem:[%s1397_s18 + $0x94] ss:$8 sps:$4 sm:$0xff]   ;;  %v1137_v63 = vld [vmem:[%s1397_s18 + $0x90] ss:$8 sps:$4 sm:$0xff]   ;;  %v1138_v0 = vld [vmem:[%s1397_s18 + $0x84] ss:$8 sps:$4 sm:$0xff]  }
  0x3b   : > { %712 = vmatpush1.bf16.msra.mxu0 %v1101_v39  ;;  %1021 = vmatpush1.bf16.msra.mxu1 %v1101_v39  ;;  %v1140_v1 = vld [vmem:[%s1397_s18 + $0x80] ss:$8 sps:$4 sm:$0xff]   ;;  %v1147_v4 = vld [vmem:[%s1527_s0 + $0x14] ss:$8 sps:$4 sm:$0xff]   ;;  %v1151_v6 = vld [vmem:[%s1527_s0 + $0x10] ss:$8 sps:$4 sm:$0xff]  }
  0x3c   : > { %713 = vmatprep.subr.bf16.mxu0 %v1102_v40  ;;  %1006 = vmatprep.subr.bf16.mxu1 %v1102_v40  ;;  %v1141_v2 = vld [vmem:[%s1527_s0] ss:$8 sps:$4 sm:$0xff]   ;;  %v1149_v5 = vld [vmem:[%s1527_s0 + $0x34] ss:$8 sps:$4 sm:$0xff]   ;;  %v1152_v7 = vld [vmem:[%s1527_s0 + $0x30] ss:$8 sps:$4 sm:$0xff]  }
  0x3d   : > { %v1144_v3 = vld [vmem:[%s1527_s0 + $0x20] ss:$8 sps:$4 sm:$0xff]   ;;  %s1541_s9 = smov (!%p413_p0, %s955_s9), 3  ;;  %v426_v9 = vshrl.u32 %v425_v8, 7  ;;  %s1153_s30 = scalar_lea.vmem %s1475_s26, 2048 }
  0x3e   : > { %s415_s18 = scalar_lea.vmem %s1529_s2, %s1541_s9  ;;  %p1154_p1 = scmp.ne.s32.totalorder %s1475_s26, %s1153_s30 }
  0x3f   : > { %714 = vmatpush1.bf16.msra.mxu0 %v1104_v41  ;;  %1022 = vmatpush1.bf16.msra.mxu1 %v1104_v41  ;;  %v427_v10 = vsub.s32 0, %v426_v9  ;;  %v423_v11 = vld [vmem:[%s415_s18] sm:$0x3]  ;;  %v431_v12 = vsub.s32 1, %v426_v9  ;;  %s1231_s4 = smov [#allocation3]  }
  0x40   : > { %715 = vmatprep.subr.bf16.mxu0 %v1105_v42  ;;  %1007 = vmatprep.subr.bf16.mxu1 %v1105_v42  ;;  %p1155_p2 = pnand %p1154_p1, %p1294_p5  ;;  %s1157_s5 = sshll.u32 %s1231_s4, 4  ;;  %s1158_s5 = int_to_ptr.vmem [resolvable:$false] %s1157_s5 }
  0x41   : > { %v428_v13 = vrot.slane %v423_v11, %v427_v10  ;;  %v432_v14 = vrot.slane %v423_v11, %v431_v12  ;;  %s1159_s7 = scalar_lea.vmem %s1158_s5, 4096  ;;  %p1160_p4 = scmp.lt.s32.totalorder %s1475_s26, %s1158_s5 }
  0x42   : > { %p1156_p3 = pneg %p1155_p2  ;;  %p1161_p6 = scmp.lt.s32.totalorder %s1159_s7, %s1153_s30 }
  0x43   : > { %716 = vmatpush1.bf16.msra.mxu0 %v1107_v43  ;;  %1023 = vmatpush1.bf16.msra.mxu1 %v1107_v43 }
  0x44   : > { %717 = vmatprep.subr.bf16.mxu0 %v1108_v44  ;;  %1008 = vmatprep.subr.bf16.mxu1 %v1108_v44  ;;  %p1162_p7 = por %p1161_p6, %p1160_p4 }
  0x46   : > { %p1163_p8 = pnand %p1162_p7, %p1156_p3 }
  0x47   : > { %718 = vmatpush1.bf16.msra.mxu0 %v1110_v45  ;;  %1024 = vmatpush1.bf16.msra.mxu1 %v1110_v45 }
  0x48   : > { %719 = vmatprep.subr.bf16.mxu0 %v1111_v46  ;;  %1009 = vmatprep.subr.bf16.mxu1 %v1111_v46 }
  0x4b   : > { %720 = vmatpush1.bf16.msra.mxu0 %v1113_v47  ;;  %1025 = vmatpush1.bf16.msra.mxu1 %v1113_v47 }
  0x4c   : > { %721 = vmatprep.subr.bf16.mxu0 %v1114_v48  ;;  %1010 = vmatprep.subr.bf16.mxu1 %v1114_v48 }
  0x4f   : > { %722 = vmatpush1.bf16.msra.mxu0 %v1116_v49  ;;  %1026 = vmatpush1.bf16.msra.mxu1 %v1116_v49 }
  0x50   : > { %723 = vmatprep.subr.bf16.mxu0 %v1117_v50  ;;  %1011 = vmatprep.subr.bf16.mxu1 %v1117_v50 }
  0x53   : > { %724 = vmatpush2.bf16.msra.mxu0 %v1119_v51  ;;  %1027 = vmatpush2.bf16.msra.mxu1 %v1119_v51 }
  0x54   : > { %725 = vmatprep.subr.bf16.mxu0 %v1120_v52  ;;  %1012 = vmatprep.subr.bf16.mxu1 %v1120_v52 }
  0x57   : > { %726 = vmatpush2.bf16.msra.mxu0 %v1122_v53  ;;  %1028 = vmatpush2.bf16.msra.mxu1 %v1122_v53 }
  0x58   : > { %727 = vmatprep.subr.bf16.mxu0 %v1123_v54  ;;  %1013 = vmatprep.subr.bf16.mxu1 %v1123_v54 }
  0x5b   : > { %728 = vmatpush2.bf16.msra.mxu0 %v1125_v55  ;;  %1029 = vmatpush2.bf16.msra.mxu1 %v1125_v55 }
  0x5c   : > { %729 = vmatprep.subr.bf16.mxu0 %v1126_v56  ;;  %1014 = vmatprep.subr.bf16.mxu1 %v1126_v56 }
  0x5f   : > { %730 = vmatpush2.bf16.msra.mxu0 %v1128_v57  ;;  %1030 = vmatpush2.bf16.msra.mxu1 %v1128_v57 }
  0x60   : > { %731 = vmatprep.subr.bf16.mxu0 %v1129_v58  ;;  %1015 = vmatprep.subr.bf16.mxu1 %v1129_v58 }
  0x63   : > { %732 = vmatpush2.bf16.msra.mxu0 %v1131_v59  ;;  %1031 = vmatpush2.bf16.msra.mxu1 %v1131_v59 }
  0x64   : > { %733 = vmatprep.subr.bf16.mxu0 %v1132_v60  ;;  %1016 = vmatprep.subr.bf16.mxu1 %v1132_v60 }
  0x67   : > { %734 = vmatpush2.bf16.msra.mxu0 %v1134_v61  ;;  %1032 = vmatpush2.bf16.msra.mxu1 %v1134_v61 }
  0x68   : > { %735 = vmatprep.subr.bf16.mxu0 %v1135_v62  ;;  %1017 = vmatprep.subr.bf16.mxu1 %v1135_v62 }
  0x6b   : > { %736 = vmatpush2.bf16.msra.mxu0 %v1137_v63  ;;  %1033 = vmatpush2.bf16.msra.mxu1 %v1137_v63 }
  0x6c   : > { %737 = vmatprep.subr.bf16.mxu0 %v1138_v0  ;;  %1018 = vmatprep.subr.bf16.mxu1 %v1138_v0 }
  0x6f   : > { %738 = vmatpush2.bf16.msra.mxu0 %v1140_v1  ;;  %1034 = vmatpush2.bf16.msra.mxu1 %v1140_v1 }
  0x72   : > { %740 = vmatmul.mubr.bf16.vlgmr.msra.gmra.mxu0 %v1141_v2  ;;  %760 = vmatmul.mubr.bf16.vlgmr.msra.gmra.mxu1 %v1144_v3 }
  0x73   : > { %749 = vmatprep.mubr.bf16.mxu0 %v1147_v4  ;;  %769 = vmatprep.mubr.bf16.mxu1 %v1149_v5 }
  0x7a   : > { %750 = vmatmul.mubr.bf16.gmra.mxu0 %v1151_v6  ;;  %770 = vmatmul.mubr.bf16.gmra.mxu1 %v1152_v7 }
 0x132   : > { %v741_v15 = vpop.f32.mrf.mxu0  ;;  %v761_v16 = vpop.f32.mrf.mxu1 }
 0x133   : > { %v780_v17 = vadd.f32 %v741_v15, %v428_v13  ;;  %v788_v18 = vadd.f32 %v761_v16, %v428_v13 }
 0x134   : > { %v743_v19 = vpop.f32.mrf.mxu0  ;;  %v763_v20 = vpop.f32.mrf.mxu1 }
 0x135   : > { %796 = vst [vmem:[%s1454_s21] sm:$0xff] %v780_v17  ;;  %804 = vst [vmem:[%s1454_s21 + $0x40] sm:$0xff] %v788_v18  ;;  %v781_v21 = vadd.f32 %v743_v19, %v432_v14  ;;  %v789_v22 = vadd.f32 %v763_v20, %v432_v14 }
 0x136   : > { %v745_v23 = vpop.f32.mrf.mxu0  ;;  %v765_v24 = vpop.f32.mrf.mxu1 }
 0x137   : > { %797 = vst [vmem:[%s1454_s21 + $0x8] sm:$0xff] %v781_v21  ;;  %805 = vst [vmem:[%s1454_s21 + $0x48] sm:$0xff] %v789_v22  ;;  %v782_v25 = vadd.f32 %v745_v23, %v428_v13  ;;  %v790_v26 = vadd.f32 %v765_v24, %v428_v13 }
 0x138   : > { %v747_v27 = vpop.f32.mrf.mxu0  ;;  %v767_v28 = vpop.f32.mrf.mxu1 }
 0x139   : > { %798 = vst [vmem:[%s1454_s21 + $0x10] sm:$0xff] %v782_v25  ;;  %806 = vst [vmem:[%s1454_s21 + $0x50] sm:$0xff] %v790_v26  ;;  %v783_v29 = vadd.f32 %v747_v27, %v432_v14  ;;  %v791_v30 = vadd.f32 %v767_v28, %v432_v14 }
 0x13a   : > { %v751_v31 = vpop.f32.mrf.mxu0  ;;  %v771_v32 = vpop.f32.mrf.mxu1 }
 0x13b   : > { %799 = vst [vmem:[%s1454_s21 + $0x18] sm:$0xff] %v783_v29  ;;  %807 = vst [vmem:[%s1454_s21 + $0x58] sm:$0xff] %v791_v30  ;;  %v784_v33 = vadd.f32 %v751_v31, %v428_v13  ;;  %v792_v34 = vadd.f32 %v771_v32, %v428_v13 }
 0x13c   : > { %v753_v35 = vpop.f32.mrf.mxu0  ;;  %v773_v36 = vpop.f32.mrf.mxu1 }
 0x13d   : > { %800 = vst [vmem:[%s1454_s21 + $0x20] sm:$0xff] %v784_v33  ;;  %808 = vst [vmem:[%s1454_s21 + $0x60] sm:$0xff] %v792_v34  ;;  %v785_v37 = vadd.f32 %v753_v35, %v432_v14  ;;  %v793_v38 = vadd.f32 %v773_v36, %v432_v14 }
 0x13e   : > { %v755_v39 = vpop.f32.mrf.mxu0  ;;  %v775_v40 = vpop.f32.mrf.mxu1 }
 0x13f   : > { %801 = vst [vmem:[%s1454_s21 + $0x28] sm:$0xff] %v785_v37  ;;  %809 = vst [vmem:[%s1454_s21 + $0x68] sm:$0xff] %v793_v38  ;;  %v786_v41 = vadd.f32 %v755_v39, %v428_v13  ;;  %v794_v42 = vadd.f32 %v775_v40, %v428_v13 }
 0x140   : > { %v757_v43 = vpop.f32.mrf.mxu0  ;;  %v777_v44 = vpop.f32.mrf.mxu1 }
 0x141   : > { %802 = vst [vmem:[%s1454_s21 + $0x30] sm:$0xff] %v786_v41  ;;  %810 = vst [vmem:[%s1454_s21 + $0x70] sm:$0xff] %v794_v42  ;;  %v787_v45 = vadd.f32 %v757_v43, %v432_v14  ;;  %v795_v46 = vadd.f32 %v777_v44, %v432_v14 }
 0x143   : > { %803 = vst [vmem:[%s1454_s21 + $0x38] sm:$0xff] %v787_v45  ;;  %811 = vst [vmem:[%s1454_s21 + $0x78] sm:$0xff] %v795_v46 }
 0x144   : > { %1166 = shalt.err (!%p1163_p8)
}
 0x145   : > { %s1167_s8 = scalar_lea.hbm %s1473_s15, 2048  ;;  %s1171_s11 = scalar_lea.hbm %s1530_s3, 4096 }
 0x146   : > { %p1168_p11 = scmp.ne.s32.totalorder %s1473_s15, %s1167_s8  ;;  %p1172_p0 = scmp.lt.s32.totalorder %s1473_s15, %s1530_s3 }
 0x147   : > { %p1173_p1 = scmp.lt.s32.totalorder %s1171_s11, %s1167_s8 }
 0x148   : > { %p1169_p12 = pnand %p1168_p11, %p1294_p5 }
 0x149   : > { %p1174_p2 = por %p1173_p1, %p1172_p0 }
 0x14a   : > { %p1170_p13 = pneg %p1169_p12 }
 0x14c   : > { %p1175_p3 = pnand %p1174_p2, %p1170_p13 }
 0x14e   : > { %1178 = shalt.err (!%p1175_p3)
}
 0x14f   : > { %s1232_s21 = smov 256   ;;  %s1233_s23 = smov 512  }
 0x150   : > { %s1234_s27 = smov 16  }
 0x151   : > { %1035 = dma.vmem_to_hbm [thread:$0]  (%p1294_p5), %s1475_s26, 2048, %s1473_s15, %s813_s29, %s1232_s21, %s1233_s23, %s1234_s27  }
 0x152 PF: > { %s844_s28 = sand.u32 1, %s1209_s12   ;;  %p1038_p4 = pnand %p948_p10, %p1305_p9 }
 0x153   : > { %s845_s30 = scalar_lea.sflag [#allocation4], %s844_s28 }
 0x154   : > { %p1039_p6 = pneg %p1038_p4 }
 0x156   : > { %1204 = dma.done.wait (%p1039_p6), %s845_s30, 2048  }
 0x157   : > { %1206 = vsyncadd (%p1039_p6), %s845_s30, 4294965248  ;;  %s16_s17 = sadd.s32 1, %s1229_s17   ;;  %s1533_s12 = smov %s1213_s13 }
 0x158   : > { %p13_p7 = scmp.ge.s32.totalorder %s16_s17, 4   ;;  %s1534_s13 = smov %s1217_s14 }
 0x159   : > { %s1535_s14 = smov %s1303_s24  ;;  %s1536_s15 = smov %s1225_s16 }
 0x15a   : > { %s1537_s16 = smov %s1539_s20  ;;  %15 = sbr.rel (!%p13_p7) target bundleno = 4 (0x4), region = 120 }
 0x15f   :  { %850 = vsyncpa [#allocation4], 1 }
 0x160   :  { %852 = vsyncpa [#allocation4 + $0x1], 1 }

// kernel: _forward_device.2
= control target key start
LH: loop header
LB: loop body
LE: loop exit
PB: predicated region body
PF: predicated region fallthrough
CT: control target
= control target key end

     0   :  { %8 = vsyncpa [#allocation3], 0  ;;  %s1301_s0 = inlined_call_operand.hbm [shape: bf16[14,768], index: 0, kind: input, shape index: {}]   ;;  %s1302_s1 = inlined_call_operand.vmem [shape: f32[14,1], index: 1, kind: input, shape index: {}]   ;;  %s1303_s2 = inlined_call_operand.hbm [shape: f32[2,768,256], index: 2, kind: input, shape index: {}]   ;;  %s1304_s3 = inlined_call_operand.vmem [shape: bf16[2,14,256], index: 3, kind: output, shape index: {}]  }
   0x1   :  { %9 = vsyncpa [#allocation5], 0 }
   0x2   :  { %11 = vsyncpa [#allocation5 + $0x1], 0  ;;  %s975_s12 = smov 0   ;;  %s977_s13 = smov 0  }
   0x3   :  { %s979_s14 = smov 0   ;;  %s981_s15 = smov 0  }
   0x4 LB: > { %s994_s16 = sadd.s32 4294967295, %s946_s15   ;;  %p79_p0 = scmp.ne.s32.totalorder %s938_s13, %s934_s12  ;;  %s946_s15 = sphi %s981_s15, %s1319_s15   ;;  %s942_s14 = sphi %s979_s14, %s1318_s14   ;;  %s938_s13 = sphi %s977_s13, %s1317_s13   ;;  %s934_s12 = sphi %s975_s12, %s1316_s12  }
   0x5   : > { %p1305_p1 = scmp.eq.s32.totalorder %s994_s16, 0  ;;  %p765_p2 = scmp.ge.s32.totalorder %s946_s15, 1 }
   0x6   : > { %p116_p3 = scmp.lt.s32.totalorder %s946_s15, 3  ;;  %s948_s19 = smov [#allocation2]  }
   0x7   : > { %p1002_p4 = por %p1305_p1, %p79_p0  ;;  %s128_s20 = sshll.u32 %s948_s19, 4  ;;  %s129_s20 = int_to_ptr.vmem [resolvable:$true] %s128_s20 }
   0x8   : > { %p1006_p5 = pnand %p765_p2, %p116_p3  ;;  %s1019_s22 = sadd.s32 1, %s946_s15  }
   0x9   : > { %s1308_s17 = scalar_select %p1002_p4, 1, 0 }
   0xa   : > { %s1309_s18 = scalar_select %p1006_p5, 1, 0 }
   0xb   : > { %p795_p6 = pneg %p1006_p5  ;;  %s66_s23 = sadd.s32 1, %s942_s14 }
   0xc   : > { %s63_s24 = ssub.s32 %s946_s15, %s1019_s22  ;;  %s865_s25 = scalar_lea.vmem %s129_s20, 768 }
   0xd   : > { %p1014_p7 = pnand %p795_p6, %p1305_p1  ;;  %p866_p9 = scmp.ne.s32.totalorder %s129_s20, %s865_s25 }
   0xe   : > { %p873_p12 = scmp.lt.s32.totalorder %s129_s20, %s129_s20  ;;  %p874_p13 = scmp.lt.s32.totalorder %s865_s25, %s865_s25 }
   0xf   : > { %p856_p8 = pneg %p1014_p7 }
  0x10   : > { %p875_p0 = por %p874_p13, %p873_p12 }
  0x11   : > { %p868_p10 = pnand %p866_p9, %p856_p8 }
  0x13   : > { %p869_p11 = pneg %p868_p10 }
  0x15   : > { %p876_p2 = pnand %p875_p0, %p869_p11 }
  0x17   : > { %879 = shalt.err (!%p876_p2)
}
  0x18   : > { %s949_s26 = smov 384   ;;  %s950_s27 = smov 24  }
  0x19   : > { %798 = dma.hbm_to_vmem [thread:$0]  (!%p1014_p7), %s1301_s0, 768, %s129_s20, [#allocation3], %s949_s26, %s949_s26, %s950_s27  }
  0x1a   : > { %p64_p3 = scmp.eq.s32.totalorder %s63_s24, 0  ;;  %p73_p6 = scmp.ne.s32.totalorder %s942_s14, %s938_s13 }
  0x1b   : > { %p74_p8 = scmp.eq.s32.totalorder %s946_s15, 0  ;;  %p804_p9 = scmp.lt.s32.totalorder %s946_s15, 2 }
  0x1c   : > { %s1036_s30 = scalar_select %p64_p3, %s942_s14, %s66_s23  }
  0x1d   : > { %p75_p10 = por %p74_p8, %p73_p6  ;;  %s145_s4 = sand.u32 1, %s942_s14  }
  0x1e   : > { %s786_s5 = smul.u32 1536, %s145_s4  ;;  %s1051_s19 = scalar_lea.sflag [#allocation5], %s145_s4 }
  0x1f   : > { %s787_s6 = smul.u32 24576, %s946_s15  ;;  %p1040_p11 = pnand %p804_p9, %p75_p10 }
  0x20   : > { %s149_s11 = scalar_lea.vmem [#allocation4], %s786_s5  ;;  %s885_s23 = scalar_lea.hbm %s1303_s2, 49152 }
  0x21   : > { %s1047_s10 = scalar_lea.hbm %s1303_s2, %s787_s6  ;;  %s156_s12 = sshll.u32 %s149_s11, 4  ;;  %s1049_s12 = int_to_ptr.vmem [resolvable:$true] %s156_s12 }
  0x22   : > { %s880_s15 = scalar_lea.hbm %s1047_s10, 24576  ;;  %p882_p12 = pneg %p1040_p11 }
  0x23   : > { %p881_p7 = scmp.ne.s32.totalorder %s1047_s10, %s880_s15  ;;  %p886_p2 = scmp.lt.s32.totalorder %s1047_s10, %s1303_s2 }
  0x24   : > { %p887_p3 = scmp.lt.s32.totalorder %s885_s23, %s880_s15 }
  0x25   : > { %p883_p13 = pnand %p882_p12, %p881_p7 }
  0x26   : > { %p888_p6 = por %p887_p3, %p886_p2 }
  0x27   : > { %p884_p0 = pneg %p883_p13 }
  0x29   : > { %p889_p8 = pnand %p888_p6, %p884_p0 }
  0x2b   : > { %892 = shalt.err (!%p889_p8)
}
  0x2c   : > { %s893_s26 = scalar_lea.vmem %s1049_s12, 24576  ;;  %s951_s27 = smov [#allocation4]  }
  0x2d   : > { %p894_p9 = scmp.ne.s32.totalorder %s1049_s12, %s893_s26  ;;  %s898_s28 = sshll.u32 %s951_s27, 4  ;;  %s899_s28 = int_to_ptr.vmem [resolvable:$false] %s898_s28 }
  0x2e   : > { %s900_s29 = scalar_lea.vmem %s899_s28, 49152  ;;  %p901_p13 = scmp.lt.s32.totalorder %s1049_s12, %s899_s28 }
  0x2f   : > { %p896_p10 = pnand %p894_p9, %p882_p12  ;;  %p902_p1 = scmp.lt.s32.totalorder %s900_s29, %s893_s26 }
  0x31   : > { %p897_p7 = pneg %p896_p10  ;;  %p903_p4 = por %p902_p1, %p901_p13 }
  0x33   : > { %p904_p5 = pnand %p903_p4, %p897_p7 }
  0x35   : > { %907 = shalt.err (!%p904_p5)
}
  0x36   : > { %s952_s4 = smov 256   ;;  %s953_s5 = smov 16  }
  0x37   : > { %802 = dma.hbm_to_vmem [thread:$0]  (!%p1040_p11), %s1047_s10, 24576, %s1049_s12, %s1051_s19, %s952_s4, %s952_s4, %s953_s5  }
  0x38   : > { %p1312_p12 = scmp.ne.s32.totalorder %s1309_s18, 0 }
  0x39   : > { %p1313_p0 = scmp.eq.s32.totalorder (!%p1312_p12), %s994_s16, 0 }
  0x3a   : > { %168 = sbr.rel (%p1312_p12) target bundleno = 404 (0x194), region = 32 }
  0x3f   : > { %925 = dma.done.wait (%p1313_p0), [#allocation3], 768   ;;  %p1314_p2 = pmov %p1313_p0 }
  0x40   : > { %s174_s6 = sand.u32 1, %s938_s13   ;;  %p1315_p1 = scmp.ne.s32.totalorder %s1308_s17, 0 }
  0x41   : > { %927 = vsyncadd (%p1314_p2), [#allocation3], 4294966528  ;;  %s788_s8 = smul.u32 1536, %s174_s6  ;;  %s175_s9 = scalar_lea.sflag [#allocation5], %s174_s6 }
  0x43   : > { %s1079_s11 = scalar_lea.vmem [#allocation4], %s788_s8 }
  0x44   : > { %929 = dma.done.wait (%p1315_p1), %s175_s9, 24576  }
  0x45   : > { %931 = vsyncadd (%p1315_p1), %s175_s9, 4294942720  ;;  %v243_v0 = vld [vmem:[%s1079_s11 + $0xe8] sm:$0xff]  ;;  %v245_v1 = vld [vmem:[%s1079_s11 + $0xf8] sm:$0xff]  ;;  %v954_v25 = vmov 0   ;;  %p201_p4 = scmp.lt.s32.totalorder %s994_s16, 1 }
  0x46   : > { %v242_v2 = vld [vmem:[%s1079_s11 + $0xe0] sm:$0xff]  ;;  %v421_v3 = vpack.c.bf16 %v245_v1, %v243_v0  ;;  %v244_v4 = vld [vmem:[%s1079_s11 + $0xf0] sm:$0xff]  ;;  %v307_v5 = vld [vmem:[%s1079_s11 + $0x2e8] sm:$0xff]  ;;  %844 = vset.pattern.permute.xlu0 %v954_v25 }
  0x47   : > { %v309_v6 = vld [vmem:[%s1079_s11 + $0x2f8] sm:$0xff]  ;;  %v420_v7 = vpack.c.bf16 %v244_v4, %v242_v2  ;;  %v306_v9 = vld [vmem:[%s1079_s11 + $0x2e0] sm:$0xff]  ;;  %v308_v10 = vld [vmem:[%s1079_s11 + $0x2f0] sm:$0xff]  ;;  %s1321_s16 = smov (!%p201_p4, %s994_s16), 1 }
  0x48   : > { %v453_v8 = vpack.c.bf16 %v309_v6, %v307_v5  ;;  %v239_v11 = vld [vmem:[%s1079_s11 + $0xc8] sm:$0xff]  ;;  %542 = vmatprep.subr.bf16.mxu0 %v421_v3  ;;  %v452_v12 = vpack.c.bf16 %v308_v10, %v306_v9  ;;  %v241_v13 = vld [vmem:[%s1079_s11 + $0xd8] sm:$0xff]  ;;  %v238_v14 = vld [vmem:[%s1079_s11 + $0xc0] sm:$0xff]  ;;  %s783_s12 = sshll.u32 %s1321_s16, 4 }
  0x49   : > { %v240_v15 = vld [vmem:[%s1079_s11 + $0xd0] sm:$0xff]  ;;  %543 = vmatpush1.bf16.msra.mxu0 %v420_v7  ;;  %v419_v16 = vpack.c.bf16 %v241_v13, %v239_v11  ;;  %v303_v18 = vld [vmem:[%s1079_s11 + $0x2c8] sm:$0xff]  ;;  %v305_v19 = vld [vmem:[%s1079_s11 + $0x2d8] sm:$0xff]  ;;  %s205_s20 = scalar_lea.vmem %s1304_s3, %s783_s12 }
  0x4a   : > { %585 = vmatprep.subr.bf16.mxu1 %v453_v8  ;;  %v418_v17 = vpack.c.bf16 %v240_v15, %v238_v14  ;;  %v302_v20 = vld [vmem:[%s1079_s11 + $0x2c0] sm:$0xff]  ;;  %v451_v21 = vpack.c.bf16 %v305_v19, %v303_v18  ;;  %v304_v22 = vld [vmem:[%s1079_s11 + $0x2d0] sm:$0xff]  ;;  %v235_v23 = vld [vmem:[%s1079_s11 + $0xa8] sm:$0xff] }
  0x4b   : > { %586 = vmatpush1.bf16.msra.mxu1 %v452_v12  ;;  %v237_v24 = vld [vmem:[%s1079_s11 + $0xb8] sm:$0xff]  ;;  %544 = vmatprep.subr.bf16.mxu0 %v419_v16  ;;  %v450_v26 = vpack.c.bf16 %v304_v22, %v302_v20  ;;  %v234_v28 = vld [vmem:[%s1079_s11 + $0xa0] sm:$0xff]  ;;  %v236_v29 = vld [vmem:[%s1079_s11 + $0xb0] sm:$0xff] }
  0x4c   : > { %v417_v27 = vpack.c.bf16 %v237_v24, %v235_v23  ;;  %v299_v30 = vld [vmem:[%s1079_s11 + $0x2a8] sm:$0xff]  ;;  %587 = vmatprep.subr.bf16.mxu1 %v451_v21  ;;  %v301_v31 = vld [vmem:[%s1079_s11 + $0x2b8] sm:$0xff]  ;;  %v298_v32 = vld [vmem:[%s1079_s11 + $0x2a0] sm:$0xff]  ;;  %v416_v34 = vpack.c.bf16 %v236_v29, %v234_v28 }
  0x4d   : > { %v300_v33 = vld [vmem:[%s1079_s11 + $0x2b0] sm:$0xff]  ;;  %545 = vmatpush1.bf16.msra.mxu0 %v418_v17  ;;  %v449_v35 = vpack.c.bf16 %v301_v31, %v299_v30  ;;  %v231_v36 = vld [vmem:[%s1079_s11 + $0x88] sm:$0xff]  ;;  %v233_v37 = vld [vmem:[%s1079_s11 + $0x98] sm:$0xff] }
  0x4e   : > { %v230_v38 = vld [vmem:[%s1079_s11 + $0x80] sm:$0xff]  ;;  %546 = vmatprep.subr.bf16.mxu0 %v417_v27  ;;  %v448_v39 = vpack.c.bf16 %v300_v33, %v298_v32  ;;  %v415_v40 = vpack.c.bf16 %v233_v37, %v231_v36  ;;  %v232_v41 = vld [vmem:[%s1079_s11 + $0x90] sm:$0xff]  ;;  %v295_v42 = vld [vmem:[%s1079_s11 + $0x288] sm:$0xff] }
  0x4f   : > { %588 = vmatpush1.bf16.msra.mxu1 %v450_v26  ;;  %v297_v43 = vld [vmem:[%s1079_s11 + $0x298] sm:$0xff]  ;;  %v294_v45 = vld [vmem:[%s1079_s11 + $0x280] sm:$0xff]  ;;  %v296_v46 = vld [vmem:[%s1079_s11 + $0x290] sm:$0xff]  ;;  %v414_v49 = vpack.c.bf16 %v232_v41, %v230_v38 }
  0x50   : > { %589 = vmatprep.subr.bf16.mxu1 %v449_v35  ;;  %v447_v44 = vpack.c.bf16 %v297_v43, %v295_v42  ;;  %v227_v47 = vld [vmem:[%s1079_s11 + $0x68] sm:$0xff]  ;;  %v229_v48 = vld [vmem:[%s1079_s11 + $0x78] sm:$0xff]  ;;  %v446_v52 = vpack.c.bf16 %v296_v46, %v294_v45  ;;  %v226_v54 = vld [vmem:[%s1079_s11 + $0x60] sm:$0xff] }
  0x51   : > { %547 = vmatpush1.bf16.msra.mxu0 %v416_v34  ;;  %v291_v50 = vld [vmem:[%s1079_s11 + $0x268] sm:$0xff]  ;;  %v293_v51 = vld [vmem:[%s1079_s11 + $0x278] sm:$0xff]  ;;  %v413_v53 = vpack.c.bf16 %v229_v48, %v227_v47  ;;  %v228_v55 = vld [vmem:[%s1079_s11 + $0x70] sm:$0xff] }
  0x52   : > { %548 = vmatprep.subr.bf16.mxu0 %v415_v40  ;;  %v290_v56 = vld [vmem:[%s1079_s11 + $0x260] sm:$0xff]  ;;  %v445_v57 = vpack.c.bf16 %v293_v51, %v291_v50  ;;  %v292_v58 = vld [vmem:[%s1079_s11 + $0x270] sm:$0xff]  ;;  %v223_v59 = vld [vmem:[%s1079_s11 + $0x48] sm:$0xff]  ;;  %v412_v63 = vpack.c.bf16 %v228_v55, %v226_v54 }
  0x53   : > { %590 = vmatpush1.bf16.msra.mxu1 %v448_v39  ;;  %v225_v60 = vld [vmem:[%s1079_s11 + $0x58] sm:$0xff]  ;;  %v287_v61 = vld [vmem:[%s1079_s11 + $0x248] sm:$0xff]  ;;  %v444_v0 = vpack.c.bf16 %v292_v58, %v290_v56  ;;  %v222_v2 = vld [vmem:[%s1079_s11 + $0x40] sm:$0xff] }
  0x54   : > { %591 = vmatprep.subr.bf16.mxu1 %v447_v44  ;;  %v289_v62 = vld [vmem:[%s1079_s11 + $0x258] sm:$0xff]  ;;  %v411_v1 = vpack.c.bf16 %v225_v60, %v223_v59  ;;  %v224_v3 = vld [vmem:[%s1079_s11 + $0x50] sm:$0xff]  ;;  %v286_v4 = vld [vmem:[%s1079_s11 + $0x240] sm:$0xff] }
  0x55   : > { %549 = vmatpush1.bf16.msra.mxu0 %v414_v49  ;;  %v443_v5 = vpack.c.bf16 %v289_v62, %v287_v61  ;;  %v288_v6 = vld [vmem:[%s1079_s11 + $0x250] sm:$0xff]  ;;  %v219_v7 = vld [vmem:[%s1079_s11 + $0x28] sm:$0xff]  ;;  %v221_v8 = vld [vmem:[%s1079_s11 + $0x38] sm:$0xff]  ;;  %v410_v11 = vpack.c.bf16 %v224_v3, %v222_v2 }
  0x56   : > { %550 = vmatprep.subr.bf16.mxu0 %v413_v53  ;;  %v283_v9 = vld [vmem:[%s1079_s11 + $0x228] sm:$0xff]  ;;  %v285_v10 = vld [vmem:[%s1079_s11 + $0x238] sm:$0xff]  ;;  %v442_v12 = vpack.c.bf16 %v288_v6, %v286_v4  ;;  %v409_v13 = vpack.c.bf16 %v221_v8, %v219_v7  ;;  %v218_v14 = vld [vmem:[%s1079_s11 + $0x20] sm:$0xff] }
  0x57   : > { %592 = vmatpush1.bf16.msra.mxu1 %v446_v52  ;;  %v220_v15 = vld [vmem:[%s1079_s11 + $0x30] sm:$0xff]  ;;  %v282_v16 = vld [vmem:[%s1079_s11 + $0x220] sm:$0xff]  ;;  %v441_v17 = vpack.c.bf16 %v285_v10, %v283_v9  ;;  %v215_v19 = vld [vmem:[%s1079_s11 + $0x8] sm:$0xff] }
  0x58   : > { %593 = vmatprep.subr.bf16.mxu1 %v445_v57  ;;  %v284_v18 = vld [vmem:[%s1079_s11 + $0x230] sm:$0xff]  ;;  %v217_v20 = vld [vmem:[%s1079_s11 + $0x18] sm:$0xff]  ;;  %v279_v21 = vld [vmem:[%s1079_s11 + $0x208] sm:$0xff]  ;;  %v408_v23 = vpack.c.bf16 %v220_v15, %v218_v14 }
  0x59   : > { %551 = vmatpush1.bf16.msra.mxu0 %v412_v63  ;;  %v281_v22 = vld [vmem:[%s1079_s11 + $0x218] sm:$0xff]  ;;  %v440_v24 = vpack.c.bf16 %v284_v18, %v282_v16  ;;  %v407_v25 = vpack.c.bf16 %v217_v20, %v215_v19  ;;  %v214_v26 = vld [vmem:[%s1079_s11] sm:$0xff]  ;;  %v216_v27 = vld [vmem:[%s1079_s11 + $0x10] sm:$0xff] }
  0x5a   : > { %552 = vmatprep.subr.bf16.mxu0 %v411_v1  ;;  %v278_v28 = vld [vmem:[%s1079_s11 + $0x200] sm:$0xff]  ;;  %v439_v29 = vpack.c.bf16 %v281_v22, %v279_v21  ;;  %v280_v30 = vld [vmem:[%s1079_s11 + $0x210] sm:$0xff]  ;;  %v275_v31 = vld [vmem:[%s1079_s11 + $0x1e8] sm:$0xff]  ;;  %v406_v35 = vpack.c.bf16 %v216_v27, %v214_v26 }
  0x5b   : > { %594 = vmatpush1.bf16.msra.mxu1 %v444_v0  ;;  %v277_v32 = vld [vmem:[%s1079_s11 + $0x1f8] sm:$0xff]  ;;  %v339_v33 = vld [vmem:[%s1079_s11 + $0x3e8] sm:$0xff]  ;;  %v438_v36 = vpack.c.bf16 %v280_v30, %v278_v28  ;;  %v274_v38 = vld [vmem:[%s1079_s11 + $0x1e0] sm:$0xff] }
  0x5c   : > { %595 = vmatprep.subr.bf16.mxu1 %v443_v5  ;;  %v341_v34 = vld [vmem:[%s1079_s11 + $0x3f8] sm:$0xff]  ;;  %v437_v37 = vpack.c.bf16 %v277_v32, %v275_v31  ;;  %v276_v39 = vld [vmem:[%s1079_s11 + $0x1f0] sm:$0xff]  ;;  %v338_v40 = vld [vmem:[%s1079_s11 + $0x3e0] sm:$0xff] }
  0x5d   : > { %553 = vmatpush1.bf16.msra.mxu0 %v410_v11  ;;  %v469_v41 = vpack.c.bf16 %v341_v34, %v339_v33  ;;  %v340_v42 = vld [vmem:[%s1079_s11 + $0x3f0] sm:$0xff]  ;;  %v271_v43 = vld [vmem:[%s1079_s11 + $0x1c8] sm:$0xff]  ;;  %v273_v44 = vld [vmem:[%s1079_s11 + $0x1d8] sm:$0xff]  ;;  %v436_v47 = vpack.c.bf16 %v276_v39, %v274_v38 }
  0x5e   : > { %554 = vmatprep.subr.bf16.mxu0 %v409_v13  ;;  %v335_v45 = vld [vmem:[%s1079_s11 + $0x3c8] sm:$0xff]  ;;  %v337_v46 = vld [vmem:[%s1079_s11 + $0x3d8] sm:$0xff]  ;;  %v468_v48 = vpack.c.bf16 %v340_v42, %v338_v40  ;;  %v435_v49 = vpack.c.bf16 %v273_v44, %v271_v43  ;;  %v270_v50 = vld [vmem:[%s1079_s11 + $0x1c0] sm:$0xff] }
  0x5f   : > { %596 = vmatpush1.bf16.msra.mxu1 %v442_v12  ;;  %v272_v51 = vld [vmem:[%s1079_s11 + $0x1d0] sm:$0xff]  ;;  %v334_v52 = vld [vmem:[%s1079_s11 + $0x3c0] sm:$0xff]  ;;  %v467_v53 = vpack.c.bf16 %v337_v46, %v335_v45  ;;  %v267_v55 = vld [vmem:[%s1079_s11 + $0x1a8] sm:$0xff] }
  0x60   : > { %597 = vmatprep.subr.bf16.mxu1 %v441_v17  ;;  %v336_v54 = vld [vmem:[%s1079_s11 + $0x3d0] sm:$0xff]  ;;  %v269_v56 = vld [vmem:[%s1079_s11 + $0x1b8] sm:$0xff]  ;;  %v331_v57 = vld [vmem:[%s1079_s11 + $0x3a8] sm:$0xff]  ;;  %v434_v59 = vpack.c.bf16 %v272_v51, %v270_v50 }
  0x61   : > { %555 = vmatpush1.bf16.msra.mxu0 %v408_v23  ;;  %v333_v58 = vld [vmem:[%s1079_s11 + $0x3b8] sm:$0xff]  ;;  %v466_v60 = vpack.c.bf16 %v336_v54, %v334_v52  ;;  %v433_v61 = vpack.c.bf16 %v269_v56, %v267_v55  ;;  %v266_v62 = vld [vmem:[%s1079_s11 + $0x1a0] sm:$0xff]  ;;  %v268_v63 = vld [vmem:[%s1079_s11 + $0x1b0] sm:$0xff] }
  0x62   : > { %556 = vmatprep.subr.bf16.mxu0 %v407_v25  ;;  %v330_v0 = vld [vmem:[%s1079_s11 + $0x3a0] sm:$0xff]  ;;  %v465_v1 = vpack.c.bf16 %v333_v58, %v331_v57  ;;  %v332_v2 = vld [vmem:[%s1079_s11 + $0x3b0] sm:$0xff]  ;;  %v263_v3 = vld [vmem:[%s1079_s11 + $0x188] sm:$0xff]  ;;  %v432_v7 = vpack.c.bf16 %v268_v63, %v266_v62 }
  0x63   : > { %598 = vmatpush1.bf16.msra.mxu1 %v440_v24  ;;  %v265_v4 = vld [vmem:[%s1079_s11 + $0x198] sm:$0xff]  ;;  %v327_v5 = vld [vmem:[%s1079_s11 + $0x388] sm:$0xff]  ;;  %v262_v8 = vld [vmem:[%s1079_s11 + $0x180] sm:$0xff]  ;;  %v464_v10 = vpack.c.bf16 %v332_v2, %v330_v0 }
  0x64   : > { %599 = vmatprep.subr.bf16.mxu1 %v439_v29  ;;  %v329_v6 = vld [vmem:[%s1079_s11 + $0x398] sm:$0xff]  ;;  %v264_v9 = vld [vmem:[%s1079_s11 + $0x190] sm:$0xff]  ;;  %v431_v11 = vpack.c.bf16 %v265_v4, %v263_v3  ;;  %v326_v12 = vld [vmem:[%s1079_s11 + $0x380] sm:$0xff] }
  0x65   : > { %557 = vmatpush1.bf16.msra.mxu0 %v406_v35  ;;  %v328_v13 = vld [vmem:[%s1079_s11 + $0x390] sm:$0xff]  ;;  %v259_v14 = vld [vmem:[%s1079_s11 + $0x168] sm:$0xff]  ;;  %v463_v15 = vpack.c.bf16 %v329_v6, %v327_v5  ;;  %v261_v16 = vld [vmem:[%s1079_s11 + $0x178] sm:$0xff]  ;;  %v430_v20 = vpack.c.bf16 %v264_v9, %v262_v8 }
  0x66   : > { %558 = vmatprep.subr.bf16.mxu0 %v437_v37  ;;  %v323_v17 = vld [vmem:[%s1079_s11 + $0x368] sm:$0xff]  ;;  %v325_v18 = vld [vmem:[%s1079_s11 + $0x378] sm:$0xff]  ;;  %v258_v21 = vld [vmem:[%s1079_s11 + $0x160] sm:$0xff]  ;;  %v462_v23 = vpack.c.bf16 %v328_v13, %v326_v12  ;;  %v429_v24 = vpack.c.bf16 %v261_v16, %v259_v14 }
  0x67   : > { %600 = vmatpush1.bf16.msra.mxu1 %v438_v36  ;;  %v847_v19 = vld [vmem:[#allocation2 + $0x4] ss:$24 sps:$4 sm:$0x7f]   ;;  %v322_v25 = vld [vmem:[%s1079_s11 + $0x360] sm:$0xff]  ;;  %v461_v27 = vpack.c.bf16 %v325_v18, %v323_v17  ;;  %v257_v29 = vld [vmem:[%s1079_s11 + $0x158] sm:$0xff] }
  0x68   : > { %601 = vmatprep.subr.bf16.mxu1 %v469_v41  ;;  %v260_v22 = vld [vmem:[%s1079_s11 + $0x170] sm:$0xff]  ;;  %v255_v28 = vld [vmem:[%s1079_s11 + $0x148] sm:$0xff]  ;;  %574 = vmatprep.mubr.bf16.mxu0 %v847_v19  ;;  %v321_v32 = vld [vmem:[%s1079_s11 + $0x358] sm:$0xff] }
  0x69   : > { %559 = vmatpush2.bf16.msra.mxu0 %v436_v47  ;;  %v324_v26 = vld [vmem:[%s1079_s11 + $0x370] sm:$0xff]  ;;  %v319_v31 = vld [vmem:[%s1079_s11 + $0x348] sm:$0xff]  ;;  %v428_v33 = vpack.c.bf16 %v260_v22, %v258_v21  ;;  %v427_v35 = vpack.c.bf16 %v257_v29, %v255_v28  ;;  %v254_v36 = vld [vmem:[%s1079_s11 + $0x140] sm:$0xff] }
  0x6a   : > { %560 = vmatprep.subr.bf16.mxu0 %v435_v49  ;;  %v850_v30 = vld [vmem:[#allocation2 + $0xc] ss:$24 sps:$4 sm:$0x7f]   ;;  %v460_v34 = vpack.c.bf16 %v324_v26, %v322_v25  ;;  %v318_v38 = vld [vmem:[%s1079_s11 + $0x340] sm:$0xff]  ;;  %v459_v39 = vpack.c.bf16 %v321_v32, %v319_v31  ;;  %v251_v41 = vld [vmem:[%s1079_s11 + $0x128] sm:$0xff] }
  0x6b   : > { %602 = vmatpush2.bf16.msra.mxu1 %v468_v48  ;;  %617 = vmatprep.mubr.bf16.mxu1 %v850_v30  ;;  %v256_v37 = vld [vmem:[%s1079_s11 + $0x150] sm:$0xff]  ;;  %v253_v42 = vld [vmem:[%s1079_s11 + $0x138] sm:$0xff]  ;;  %v315_v43 = vld [vmem:[%s1079_s11 + $0x328] sm:$0xff] }
  0x6c   : > { %603 = vmatprep.subr.bf16.mxu1 %v467_v53  ;;  %v320_v40 = vld [vmem:[%s1079_s11 + $0x350] sm:$0xff]  ;;  %v317_v44 = vld [vmem:[%s1079_s11 + $0x338] sm:$0xff]  ;;  %v426_v45 = vpack.c.bf16 %v256_v37, %v254_v36  ;;  %v425_v47 = vpack.c.bf16 %v253_v42, %v251_v41  ;;  %v250_v48 = vld [vmem:[%s1079_s11 + $0x120] sm:$0xff] }
  0x6d   : > { %561 = vmatpush2.bf16.msra.mxu0 %v434_v59  ;;  %v458_v46 = vpack.c.bf16 %v320_v40, %v318_v38  ;;  %v252_v49 = vld [vmem:[%s1079_s11 + $0x130] sm:$0xff]  ;;  %v314_v50 = vld [vmem:[%s1079_s11 + $0x320] sm:$0xff]  ;;  %v457_v51 = vpack.c.bf16 %v317_v44, %v315_v43  ;;  %v247_v53 = vld [vmem:[%s1079_s11 + $0x108] sm:$0xff] }
  0x6e   : > { %562 = vmatprep.subr.bf16.mxu0 %v433_v61  ;;  %v316_v52 = vld [vmem:[%s1079_s11 + $0x330] sm:$0xff]  ;;  %v249_v54 = vld [vmem:[%s1079_s11 + $0x118] sm:$0xff]  ;;  %v311_v55 = vld [vmem:[%s1079_s11 + $0x308] sm:$0xff]  ;;  %v424_v57 = vpack.c.bf16 %v252_v49, %v250_v48 }
  0x6f   : > { %604 = vmatpush2.bf16.msra.mxu1 %v466_v60  ;;  %v313_v56 = vld [vmem:[%s1079_s11 + $0x318] sm:$0xff]  ;;  %v456_v58 = vpack.c.bf16 %v316_v52, %v314_v50  ;;  %v423_v59 = vpack.c.bf16 %v249_v54, %v247_v53  ;;  %v246_v60 = vld [vmem:[%s1079_s11 + $0x100] sm:$0xff]  ;;  %v248_v61 = vld [vmem:[%s1079_s11 + $0x110] sm:$0xff] }
  0x70   : > { %605 = vmatprep.subr.bf16.mxu1 %v465_v1  ;;  %v310_v62 = vld [vmem:[%s1079_s11 + $0x300] sm:$0xff]  ;;  %v455_v63 = vpack.c.bf16 %v313_v56, %v311_v55  ;;  %v312_v0 = vld [vmem:[%s1079_s11 + $0x310] sm:$0xff]  ;;  %v371_v1 = vld [vmem:[%s1079_s11 + $0x4e8] sm:$0xff]  ;;  %v422_v3 = vpack.c.bf16 %v248_v61, %v246_v60 }
  0x71   : > { %563 = vmatpush2.bf16.msra.mxu0 %v432_v7  ;;  %v373_v2 = vld [vmem:[%s1079_s11 + $0x4f8] sm:$0xff]  ;;  %v454_v4 = vpack.c.bf16 %v312_v0, %v310_v62  ;;  %v370_v6 = vld [vmem:[%s1079_s11 + $0x4e0] sm:$0xff]  ;;  %v372_v7 = vld [vmem:[%s1079_s11 + $0x4f0] sm:$0xff] }
  0x72   : > { %564 = vmatprep.subr.bf16.mxu0 %v431_v11  ;;  %v485_v5 = vpack.c.bf16 %v373_v2, %v371_v1  ;;  %v367_v8 = vld [vmem:[%s1079_s11 + $0x4c8] sm:$0xff]  ;;  %v369_v9 = vld [vmem:[%s1079_s11 + $0x4d8] sm:$0xff]  ;;  %v484_v12 = vpack.c.bf16 %v372_v7, %v370_v6  ;;  %v366_v14 = vld [vmem:[%s1079_s11 + $0x4c0] sm:$0xff] }
  0x73   : > { %606 = vmatpush2.bf16.msra.mxu1 %v464_v10  ;;  %v845_v10 = vld [vmem:[#allocation2] ss:$24 sps:$4 sm:$0x7f]   ;;  %v483_v13 = vpack.c.bf16 %v369_v9, %v367_v8  ;;  %v365_v17 = vld [vmem:[%s1079_s11 + $0x4b8] sm:$0xff]  ;;  %v362_v22 = vld [vmem:[%s1079_s11 + $0x4a0] sm:$0xff] }
  0x74   : > { %607 = vmatprep.subr.bf16.mxu1 %v463_v15  ;;  %v848_v11 = vld [vmem:[#allocation2 + $0x8] ss:$24 sps:$4 sm:$0x7f]   ;;  %v363_v16 = vld [vmem:[%s1079_s11 + $0x4a8] sm:$0xff]  ;;  %v358_v29 = vld [vmem:[%s1079_s11 + $0x480] sm:$0xff] }
  0x75   : > { %565 = vmatpush2.bf16.msra.mxu0 %v430_v20  ;;  %v368_v15 = vld [vmem:[%s1079_s11 + $0x4d0] sm:$0xff]  ;;  %v853_v20 = vld [vmem:[#allocation2 + $0x14] ss:$24 sps:$4 sm:$0x7f]   ;;  %v481_v21 = vpack.c.bf16 %v365_v17, %v363_v16  ;;  %v355_v31 = vld [vmem:[%s1079_s11 + $0x468] sm:$0xff] }
  0x76   : > { %566 = vmatprep.subr.bf16.mxu0 %v429_v24  ;;  %v212_v18 = vld [vmem:[%s1302_s1] sm:$0xff]  ;;  %v482_v19 = vpack.c.bf16 %v368_v15, %v366_v14  ;;  %v359_v24 = vld [vmem:[%s1079_s11 + $0x488] sm:$0xff]  ;;  %v361_v25 = vld [vmem:[%s1079_s11 + $0x498] sm:$0xff] }
  0x77   : > { %608 = vmatpush2.bf16.msra.mxu1 %v462_v23  ;;  %v364_v23 = vld [vmem:[%s1079_s11 + $0x4b0] sm:$0xff]  ;;  %504 = vperm.xlu0 %844, %v212_v18   ;;  %v213_v26 = vld [vmem:[%s1302_s1 + $0x8] sm:$0x3f]  ;;  %v479_v28 = vpack.c.bf16 %v361_v25, %v359_v24  ;;  %v351_v37 = vld [vmem:[%s1079_s11 + $0x448] sm:$0xff] }
  0x78   : > { %609 = vmatprep.subr.bf16.mxu1 %v461_v27  ;;  %v480_v27 = vpack.c.bf16 %v364_v23, %v362_v22  ;;  %v360_v30 = vld [vmem:[%s1079_s11 + $0x490] sm:$0xff]  ;;  %v357_v32 = vld [vmem:[%s1079_s11 + $0x478] sm:$0xff]  ;;  %v350_v41 = vld [vmem:[%s1079_s11 + $0x440] sm:$0xff] }
  0x79   : > { %567 = vmatpush2.bf16.msra.mxu0 %v428_v33  ;;  %v478_v33 = vpack.c.bf16 %v360_v30, %v358_v29  ;;  %v356_v36 = vld [vmem:[%s1079_s11 + $0x470] sm:$0xff]  ;;  %v353_v38 = vld [vmem:[%s1079_s11 + $0x458] sm:$0xff]  ;;  %v347_v43 = vld [vmem:[%s1079_s11 + $0x428] sm:$0xff] }
  0x7a   : > { %568 = vmatprep.subr.bf16.mxu0 %v427_v35  ;;  %v354_v35 = vld [vmem:[%s1079_s11 + $0x460] sm:$0xff]  ;;  %v475_v40 = vpack.c.bf16 %v353_v38, %v351_v37  ;;  %v352_v42 = vld [vmem:[%s1079_s11 + $0x450] sm:$0xff]  ;;  %v349_v44 = vld [vmem:[%s1079_s11 + $0x438] sm:$0xff] }
  0x7b   : > { %610 = vmatpush2.bf16.msra.mxu1 %v460_v34  ;;  %509 = vperm.xlu0 %844, %v213_v26   ;;  %v477_v34 = vpack.c.bf16 %v357_v32, %v355_v31  ;;  %v348_v48 = vld [vmem:[%s1079_s11 + $0x430] sm:$0xff]  ;;  %v343_v49 = vld [vmem:[%s1079_s11 + $0x408] sm:$0xff]  ;;  %v345_v50 = vld [vmem:[%s1079_s11 + $0x418] sm:$0xff] }
  0x7c   : > { %611 = vmatprep.subr.bf16.mxu1 %v459_v39  ;;  %v476_v39 = vpack.c.bf16 %v356_v36, %v354_v35  ;;  %v471_v52 = vpack.c.bf16 %v345_v50, %v343_v49  ;;  %v342_v53 = vld [vmem:[%s1079_s11 + $0x400] sm:$0xff]  ;;  %v344_v54 = vld [vmem:[%s1079_s11 + $0x410] sm:$0xff]  ;;  %v403_v55 = vld [vmem:[%s1079_s11 + $0x5e8] sm:$0xff] }
  0x7d   : > { %569 = vmatpush2.bf16.msra.mxu0 %v426_v45  ;;  %v474_v45 = vpack.c.bf16 %v352_v42, %v350_v41  ;;  %v405_v56 = vld [vmem:[%s1079_s11 + $0x5f8] sm:$0xff]  ;;  %v404_v60 = vld [vmem:[%s1079_s11 + $0x5f0] sm:$0xff]  ;;  %v399_v61 = vld [vmem:[%s1079_s11 + $0x5c8] sm:$0xff] }
  0x7e   : > { %570 = vmatprep.subr.bf16.mxu0 %v425_v47  ;;  %v346_v47 = vld [vmem:[%s1079_s11 + $0x420] sm:$0xff]  ;;  %v401_v62 = vld [vmem:[%s1079_s11 + $0x5d8] sm:$0xff]  ;;  %v400_v2 = vld [vmem:[%s1079_s11 + $0x5d0] sm:$0xff] }
  0x7f   : > { %612 = vmatpush2.bf16.msra.mxu1 %v458_v46  ;;  %v473_v46 = vpack.c.bf16 %v349_v44, %v347_v43  ;;  %v499_v0 = vpack.c.bf16 %v401_v62, %v399_v61  ;;  %v398_v1 = vld [vmem:[%s1079_s11 + $0x5c0] sm:$0xff]  ;;  %v396_v8 = vld [vmem:[%s1079_s11 + $0x5b0] sm:$0xff]  ;;  %v391_v9 = vld [vmem:[%s1079_s11 + $0x588] sm:$0xff] }
  0x80   : > { %613 = vmatprep.subr.bf16.mxu1 %v457_v51  ;;  %v472_v51 = vpack.c.bf16 %v348_v48, %v346_v47  ;;  %v394_v7 = vld [vmem:[%s1079_s11 + $0x5a0] sm:$0xff]  ;;  %v392_v14 = vld [vmem:[%s1079_s11 + $0x590] sm:$0xff]  ;;  %v387_v15 = vld [vmem:[%s1079_s11 + $0x568] sm:$0xff] }
  0x81   : > { %571 = vmatpush2.bf16.msra.mxu0 %v424_v57  ;;  %v470_v57 = vpack.c.bf16 %v344_v54, %v342_v53  ;;  %v389_v16 = vld [vmem:[%s1079_s11 + $0x578] sm:$0xff]  ;;  %v382_v25 = vld [vmem:[%s1079_s11 + $0x540] sm:$0xff]  ;;  %v384_v26 = vld [vmem:[%s1079_s11 + $0x550] sm:$0xff] }
  0x82   : > { %572 = vmatprep.subr.bf16.mxu0 %v423_v59  ;;  %v402_v59 = vld [vmem:[%s1079_s11 + $0x5e0] sm:$0xff]  ;;  %v493_v18 = vpack.c.bf16 %v389_v16, %v387_v15  ;;  %v385_v22 = vld [vmem:[%s1079_s11 + $0x558] sm:$0xff]  ;;  %v490_v29 = vpack.c.bf16 %v384_v26, %v382_v25  ;;  %v380_v32 = vld [vmem:[%s1079_s11 + $0x530] sm:$0xff] }
  0x83   : > { %614 = vmatpush2.bf16.msra.mxu1 %v456_v58  ;;  %v501_v58 = vpack.c.bf16 %v405_v56, %v403_v55  ;;  %v378_v31 = vld [vmem:[%s1079_s11 + $0x520] sm:$0xff]  ;;  %v376_v38 = vld [vmem:[%s1079_s11 + $0x510] sm:$0xff] }
  0x84   : > { %615 = vmatprep.subr.bf16.mxu1 %v455_v63  ;;  %v500_v63 = vpack.c.bf16 %v404_v60, %v402_v59  ;;  %v488_v35 = vpack.c.bf16 %v380_v32, %v378_v31  ;;  %v374_v37 = vld [vmem:[%s1079_s11 + $0x500] sm:$0xff] }
  0x85   : > { %573 = vmatpush2.bf16.msra.mxu0 %v422_v3  ;;  %v395_v3 = vld [vmem:[%s1079_s11 + $0x5a8] sm:$0xff] }
  0x86   : > { %628 = vmatprep.subr.bf16.mxu0 %v485_v5  ;;  %v498_v5 = vpack.c.bf16 %v400_v2, %v398_v1 }
  0x87   : > { %616 = vmatpush2.bf16.msra.mxu1 %v454_v4  ;;  %v397_v4 = vld [vmem:[%s1079_s11 + $0x5b8] sm:$0xff] }
  0x88   : > { %575 = vmatmul.mubr.bf16.vlgmr.msra.gmra.mxu0 %v845_v10  ;;  %v497_v6 = vpack.c.bf16 %v397_v4, %v395_v3  ;;  %v393_v10 = vld [vmem:[%s1079_s11 + $0x598] sm:$0xff] }
  0x89   : > { %629 = vmatpush1.bf16.msra.mxu0 %v484_v12  ;;  %660 = vmatprep.mubr.bf16.mxu0 %v853_v20  ;;  %v495_v12 = vpack.c.bf16 %v393_v10, %v391_v9  ;;  %v388_v20 = vld [vmem:[%s1079_s11 + $0x570] sm:$0xff] }
  0x8a   : > { %618 = vmatmul.mubr.bf16.vlgmr.msra.gmra.mxu1 %v848_v11  ;;  %630 = vmatprep.subr.bf16.mxu0 %v483_v13  ;;  %v496_v11 = vpack.c.bf16 %v396_v8, %v394_v7  ;;  %v390_v13 = vld [vmem:[%s1079_s11 + $0x580] sm:$0xff] }
  0x8b   : > { %v494_v17 = vpack.c.bf16 %v392_v14, %v390_v13 }
  0x8d   : > { %631 = vmatpush1.bf16.msra.mxu0 %v482_v19  ;;  %v386_v19 = vld [vmem:[%s1079_s11 + $0x560] sm:$0xff] }
  0x8e   : > { %632 = vmatprep.subr.bf16.mxu0 %v481_v21  ;;  %v383_v21 = vld [vmem:[%s1079_s11 + $0x548] sm:$0xff]  ;;  %v492_v23 = vpack.c.bf16 %v388_v20, %v386_v19 }
  0x8f   : > { %v491_v24 = vpack.c.bf16 %v385_v22, %v383_v21 }
  0x91   : > { %633 = vmatpush1.bf16.msra.mxu0 %v480_v27  ;;  %v379_v27 = vld [vmem:[%s1079_s11 + $0x528] sm:$0xff] }
  0x92   : > { %634 = vmatprep.subr.bf16.mxu0 %v479_v28  ;;  %v381_v28 = vld [vmem:[%s1079_s11 + $0x538] sm:$0xff] }
  0x93   : > { %v489_v30 = vpack.c.bf16 %v381_v28, %v379_v27 }
  0x95   : > { %635 = vmatpush1.bf16.msra.mxu0 %v478_v33  ;;  %v375_v33 = vld [vmem:[%s1079_s11 + $0x508] sm:$0xff] }
  0x96   : > { %636 = vmatprep.subr.bf16.mxu0 %v477_v34  ;;  %v377_v34 = vld [vmem:[%s1079_s11 + $0x518] sm:$0xff] }
  0x97   : > { %v487_v36 = vpack.c.bf16 %v377_v34, %v375_v33 }
  0x99   : > { %637 = vmatpush1.bf16.msra.mxu0 %v476_v39  ;;  %v486_v39 = vpack.c.bf16 %v376_v38, %v374_v37 }
  0x9a   : > { %638 = vmatprep.subr.bf16.mxu0 %v475_v40  ;;  %v851_v40 = vld [vmem:[#allocation2 + $0x10] ss:$24 sps:$4 sm:$0x7f]  }
  0x9d   : > { %639 = vmatpush1.bf16.msra.mxu0 %v474_v45 }
  0x9e   : > { %640 = vmatprep.subr.bf16.mxu0 %v473_v46 }
  0xa1   : > { %641 = vmatpush1.bf16.msra.mxu0 %v472_v51 }
  0xa2   : > { %642 = vmatprep.subr.bf16.mxu0 %v471_v52 }
  0xa5   : > { %643 = vmatpush1.bf16.msra.mxu0 %v470_v57 }
  0xa6   : > { %644 = vmatprep.subr.bf16.mxu0 %v501_v58 }
  0xa9   : > { %645 = vmatpush2.bf16.msra.mxu0 %v500_v63 }
  0xaa   : > { %646 = vmatprep.subr.bf16.mxu0 %v499_v0 }
  0xad   : > { %647 = vmatpush2.bf16.msra.mxu0 %v498_v5 }
  0xae   : > { %648 = vmatprep.subr.bf16.mxu0 %v497_v6 }
  0xb1   : > { %649 = vmatpush2.bf16.msra.mxu0 %v496_v11 }
  0xb2   : > { %650 = vmatprep.subr.bf16.mxu0 %v495_v12 }
  0xb5   : > { %651 = vmatpush2.bf16.msra.mxu0 %v494_v17 }
  0xb6   : > { %652 = vmatprep.subr.bf16.mxu0 %v493_v18 }
  0xb9   : > { %653 = vmatpush2.bf16.msra.mxu0 %v492_v23 }
  0xba   : > { %654 = vmatprep.subr.bf16.mxu0 %v491_v24 }
  0xbd   : > { %655 = vmatpush2.bf16.msra.mxu0 %v490_v29 }
  0xbe   : > { %656 = vmatprep.subr.bf16.mxu0 %v489_v30 }
  0xc1   : > { %657 = vmatpush2.bf16.msra.mxu0 %v488_v35 }
  0xc2   : > { %658 = vmatprep.subr.bf16.mxu0 %v487_v36 }
  0xc5   : > { %659 = vmatpush2.bf16.msra.mxu0 %v486_v39 }
  0xc8   : > { %661 = vmatmul.mubr.bf16.vlgmr.msra.gmra.mxu0 %v851_v40 }
  0xf2   : > { %v505_v44 = vpop.permute.xlu0 %504 }
  0xf6   : > { %v510_v49 = vpop.permute.xlu0 %509 }
 0x148   : > { %v576_v41 = vpop.f32.mrf.mxu0 }
 0x149   : > { %v577_v47 = vadd.f32 %v576_v41, %v505_v44 }
 0x14a   : > { %v578_v42 = vpop.f32.mrf.mxu0  ;;  %v619_v43 = vpop.f32.mrf.mxu1 }
 0x14b   : > { %v579_v48 = vadd.f32 %v578_v42, %v505_v44  ;;  %v620_v53 = vadd.f32 %v619_v43, %v577_v47 }
 0x14c   : > { %v580_v45 = vpop.f32.mrf.mxu0  ;;  %v621_v46 = vpop.f32.mrf.mxu1 }
 0x14d   : > { %v581_v54 = vadd.f32 %v580_v45, %v510_v49  ;;  %v622_v55 = vadd.f32 %v621_v46, %v579_v48 }
 0x14e   : > { %v582_v50 = vpop.f32.mrf.mxu0  ;;  %v623_v51 = vpop.f32.mrf.mxu1 }
 0x14f   : > { %v583_v56 = vadd.f32 %v582_v50, %v510_v49  ;;  %v624_v62 = vadd.f32 %v623_v51, %v581_v54 }
 0x150   : > { %v625_v57 = vpop.f32.mrf.mxu1 }
 0x151   : > { %v626_v63 = vadd.f32 %v625_v57, %v583_v56 }
 0x188   : > { %v662_v52 = vpop.f32.mrf.mxu0 }
 0x189   : > { %v663_v59 = vadd.f32 %v662_v52, %v620_v53 }
 0x18a   : > { %v664_v58 = vpop.f32.mrf.mxu0 }
 0x18b   : > { %v665_v60 = vadd.f32 %v664_v58, %v622_v55 }
 0x18c   : > { %v666_v61 = vpop.f32.mrf.mxu0 }
 0x18d   : > { %v784_v0 = vpack.c.bf16 %v665_v60, %v663_v59  ;;  %v667_v2 = vadd.f32 %v666_v61, %v624_v62 }
 0x18e   : > { %v668_v1 = vpop.f32.mrf.mxu0 }
 0x18f   : > { %683 = vst [vmem:[%s205_s20] sm:$0xff] %v784_v0  ;;  %v669_v3 = vadd.f32 %v668_v1, %v626_v63 }
 0x191   : > { %v785_v4 = vpack.c.bf16 %v669_v3, %v667_v2 }
 0x193   : > { %684 = vst [vmem:[%s205_s20 + $0x8] sm:$0x77] %v785_v4 }
 0x194 PF: > { %p14_p5 = scmp.ge.s32.totalorder %s1019_s22, 4   ;;  %s1316_s12 = smov %s938_s13 }
 0x195   : > { %s1317_s13 = smov %s942_s14  ;;  %s1318_s14 = smov %s1036_s30 }
 0x196   : > { %s1319_s15 = smov %s1019_s22  ;;  %16 = sbr.rel (!%p14_p5) target bundleno = 4 (0x4), region = 77 }
 0x19b   :  { %706 = vsyncpa [#allocation3], 1 }
 0x19c   :  { %708 = vsyncpa [#allocation3 + $0x1], 1 }
 0x19d   :  { %709 = vsyncpa [#allocation5], 1 }
 0x19e   :  { %711 = vsyncpa [#allocation5 + $0x1], 1 }

</bundles_post_ra>
